<compile_context>
chip_gen: v6e
topology: v6e:2x2x1
jax: 0.10.0
libtpu: 0.0.40
codegen_flags: <defaults>
</compile_context>

<pallas_src>
import jax
import jax.numpy as jnp
from jax.experimental import pallas as pl
from jax.experimental.pallas import tpu as pltpu

NUM_CLASSES = 10
NUM_FEATURES = 784
HEAD_PAD = 128                 # lane-dense padded head width (10 -> 128)
HIDDEN_PAD = 128               # layer-3 output padded width (64 -> 128)
LAYER_DIMS = [NUM_FEATURES, 256, 128, 64, NUM_CLASSES]

MAX_BATCH_TILE = 2048
VMEM_LIMIT_BYTES = 40 * 1024 * 1024   # > v5e 16 MiB default, << v7x 64 MiB phys


def _round_up(x, m):
    return (x + m - 1) // m * m


def _choose_batch_tile(n, max_tile=MAX_BATCH_TILE):
    """Pick a sublane-aligned batch tile minimizing (padded rows + per-step
    overhead), preferring >=2 grid steps so both v7x TensorCores are used."""
    max_tile = max(int(max_tile), 16)
    best_bt, best_cost = None, None
    for bt in (16, 32, 64, 128, 256, 512, 1024, 2048):
        if bt > max_tile:
            continue
        if bt > n and bt > 16:          # never use a tile (much) larger than n
            continue
        n_pad = _round_up(n, bt)
        steps = n_pad // bt
        # Cost in row-equivalents: padded rows + ~128 rows of fixed overhead
        # per grid step; a 1-step grid idles one v7x core -> ~n_pad/2 penalty.
        cost = n_pad + 128 * steps + (n_pad // 2 if steps == 1 else 0)
        if best_cost is None or cost < best_cost or (cost == best_cost and bt > best_bt):
            best_bt, best_cost = bt, cost
    return best_bt


def mlp_kernel(x_ref,
               w1_ref, b1_ref,
               w2_ref, b2_ref,
               w3_ref, b3_ref,
               w4_ref, b4_ref,
               o_ref):
    """Fused 4-layer MLP forward for one batch tile.

    All weights (~0.5 MB bf16) stay resident in VMEM; matmul operands are bf16
    with f32 MXU accumulation; bias/ReLU math is f32 (v5e VPU has no bf16)."""
    # Layer 1: 784 -> 256 (dominant matmul). x arrives f32; cast in-kernel.
    x = x_ref[...].astype(jnp.bfloat16)
    h = jnp.dot(x, w1_ref[...], preferred_element_type=jnp.float32)
    h = jnp.maximum(h + b1_ref[...], 0.0)

    # Layer 2: 256 -> 128
    h = jnp.dot(h.astype(jnp.bfloat16), w2_ref[...],
                preferred_element_type=jnp.float32)
    h = jnp.maximum(h + b2_ref[...], 0.0)

    # Layer 3: 128 -> 64, zero-padded to 128 output lanes (lane-dense h3).
    h = jnp.dot(h.astype(jnp.bfloat16), w3_ref[...],
                preferred_element_type=jnp.float32)
    h = jnp.maximum(h + b3_ref[...], 0.0)

    # Layer 4 (head): 128(pad) -> 128(pad), no activation; bf16 writeback.
    out = jnp.dot(h.astype(jnp.bfloat16), w4_ref[...],
                  preferred_element_type=jnp.float32)
    o_ref[...] = (out + b4_ref[...]).astype(o_ref.dtype)


def prepare_params(params):
    """One-time weight prep (cast to bf16 + zero-pad); cache the result and
    reuse it across forward calls."""
    (w1, b1), (w2, b2), (w3, b3), (w4, b4) = params
    w1b = w1.astype(jnp.bfloat16)                                   # (784, 256)
    w2b = w2.astype(jnp.bfloat16)                                   # (256, 128)
    # Layer 3: pad output dim 64 -> 128 with zero columns.
    w3p = jnp.pad(w3, ((0, 0), (0, HIDDEN_PAD - w3.shape[1]))).astype(jnp.bfloat16)
    b3p = jnp.pad(b3, ((0, 0), (0, HIDDEN_PAD - b3.shape[1])))
    # Layer 4: pad input dim 64 -> 128 (zero rows) and output 10 -> 128.
    w4p = jnp.pad(w4, ((0, HIDDEN_PAD - w4.shape[0]),
                       (0, HEAD_PAD - w4.shape[1]))).astype(jnp.bfloat16)
    b4p = jnp.pad(b4, ((0, 0), (0, HEAD_PAD - b4.shape[1])))
    return (w1b, b1, w2b, b2, w3p, b3p, w4p, b4p)


def mlp_forward(x, prepared, *, max_batch_tile=MAX_BATCH_TILE):
    """x: [N, 784] float32.  prepared: output of prepare_params()."""
    n, f = x.shape
    assert f == NUM_FEATURES
    w1b, b1, w2b, b2, w3p, b3p, w4p, b4p = prepared

    bt = _choose_batch_tile(n, max_batch_tile)
    grid = (pl.cdiv(n, bt),)

    def full_spec(arr):
        nd = arr.ndim
        return pl.BlockSpec(arr.shape, lambda i, _nd=nd: (0,) * _nd)

    flops = 2 * n * (NUM_FEATURES * 256 + 256 * 128
                     + 128 * HIDDEN_PAD + HIDDEN_PAD * HEAD_PAD)
    weight_bytes = sum(int(a.size) * a.dtype.itemsize for a in prepared)
    bytes_accessed = (int(x.size) * x.dtype.itemsize      # f32 x stream
                      + weight_bytes
                      + n * HEAD_PAD * 2)                 # bf16 writeback

    out = pl.pallas_call(
        mlp_kernel,
        out_shape=jax.ShapeDtypeStruct((n, HEAD_PAD), jnp.bfloat16),
        grid_spec=pltpu.PrefetchScalarGridSpec(
            num_scalar_prefetch=0,
            grid=grid,
            in_specs=[
                pl.BlockSpec((bt, NUM_FEATURES), lambda i: (i, 0)),
                full_spec(w1b), full_spec(b1),
                full_spec(w2b), full_spec(b2),
                full_spec(w3p), full_spec(b3p),
                full_spec(w4p), full_spec(b4p),
            ],
            out_specs=pl.BlockSpec((bt, HEAD_PAD), lambda i: (i, 0)),
        ),
        compiler_params=pltpu.CompilerParams(
            dimension_semantics=("parallel",),
            vmem_limit_bytes=VMEM_LIMIT_BYTES),
        cost_estimate=pl.CostEstimate(
            flops=flops, transcendentals=0, bytes_accessed=bytes_accessed),
    )(x, w1b, b1, w2b, b2, w3p, b3p, w4p, b4p)

    # Slice off the padded head columns; give callers f32 logits.
    return out[:, :NUM_CLASSES].astype(jnp.float32)


def init_params(key):
    """Kaiming-normal (fan_in, relu) weights, zero biases — matches the
    torch.nn.init calls in the PyTorch module's __init__."""
    params = []
    for i in range(1, len(LAYER_DIMS)):
        fan_in, fan_out = LAYER_DIMS[i - 1], LAYER_DIMS[i]
        key, sub = jax.random.split(key)
        std = (2.0 / fan_in) ** 0.5  # kaiming_normal_, nonlinearity='relu'
        # torch weight is [out, in]; store transposed as [in, out] for the kernel.
        w = std * jax.random.normal(sub, (fan_in, fan_out), dtype=jnp.float32)
        b = jnp.zeros((1, fan_out), dtype=jnp.float32)
        params.append((w, b))
    return params


def reference_forward(x, params):
    """Pure-JAX reference using the same bf16-operand / f32-accumulate
    arithmetic (and bf16 output rounding) as the kernel."""
    h = x
    for idx, (w, b) in enumerate(params):
        h = jnp.dot(h.astype(jnp.bfloat16), w.astype(jnp.bfloat16),
                    preferred_element_type=jnp.float32) + b
        if idx < len(params) - 1:
            h = jnp.maximum(h, 0.0)
    return h.astype(jnp.bfloat16).astype(jnp.float32)


if __name__ == "__main__":
    key = jax.random.PRNGKey(0)
    k_params, k_x = jax.random.split(key)

    params = init_params(k_params)
    prepared = prepare_params(params)   # cast/pad once, reuse across calls

    batch = 100  # not a tile multiple -> exercises boundary-masked last block
    x = jax.random.normal(k_x, (batch, NUM_FEATURES), dtype=jnp.float32)

    out = jax.block_until_ready(mlp_forward(x, prepared))
    ref = reference_forward(x, params)

    assert out.shape == (batch, NUM_CLASSES)
    assert jnp.allclose(out, ref, atol=2e-2, rtol=2e-2), \
        float(jnp.max(jnp.abs(out - ref)))

    print("KERNEL_OK")
</pallas_src>

<mosaic_0001>
module attributes {stable_mosaic.version = 11 : i64} {
  func.func @mlp_kernel(%arg0: i32, %arg1: memref<64x784xf32, #tpu.memory_space<vmem>>, %arg2: memref<784x256xbf16, #tpu.memory_space<vmem>>, %arg3: memref<1x256xf32, #tpu.memory_space<vmem>>, %arg4: memref<256x128xbf16, #tpu.memory_space<vmem>>, %arg5: memref<1x128xf32, #tpu.memory_space<vmem>>, %arg6: memref<128x128xbf16, #tpu.memory_space<vmem>>, %arg7: memref<1x128xf32, #tpu.memory_space<vmem>>, %arg8: memref<128x128xbf16, #tpu.memory_space<vmem>>, %arg9: memref<1x128xf32, #tpu.memory_space<vmem>>, %arg10: memref<64x128xbf16, #tpu.memory_space<vmem>>) attributes {dimension_semantics = [#tpu.dimension_semantics<parallel>], iteration_bounds = array<i64: 2>, scalar_prefetch = 0 : i64, scratch_operands = 0 : i64, tpu.core_type = #tpu.core_type<tc>, window_params = [{transform_indices = @transform_0, window_bounds = array<i64: 64, 784>}, {pipeline_mode = #tpu.pipeline_mode<synchronous>, transform_indices = @transform_1, window_bounds = array<i64: 784, 256>}, {pipeline_mode = #tpu.pipeline_mode<synchronous>, transform_indices = @transform_2, window_bounds = array<i64: 1, 256>}, {pipeline_mode = #tpu.pipeline_mode<synchronous>, transform_indices = @transform_3, window_bounds = array<i64: 256, 128>}, {pipeline_mode = #tpu.pipeline_mode<synchronous>, transform_indices = @transform_4, window_bounds = array<i64: 1, 128>}, {pipeline_mode = #tpu.pipeline_mode<synchronous>, transform_indices = @transform_5, window_bounds = array<i64: 128, 128>}, {pipeline_mode = #tpu.pipeline_mode<synchronous>, transform_indices = @transform_6, window_bounds = array<i64: 1, 128>}, {pipeline_mode = #tpu.pipeline_mode<synchronous>, transform_indices = @transform_7, window_bounds = array<i64: 128, 128>}, {pipeline_mode = #tpu.pipeline_mode<synchronous>, transform_indices = @transform_8, window_bounds = array<i64: 1, 128>}, {transform_indices = @transform_9, window_bounds = array<i64: 64, 128>}]} {
    %c0 = arith.constant 0 : index
    %c0_0 = arith.constant 0 : index
    %0 = vector.load %arg1[%c0, %c0_0] : memref<64x784xf32, #tpu.memory_space<vmem>>, vector<64x784xf32>
    %1 = arith.truncf %0 : vector<64x784xf32> to vector<64x784xbf16>
    %c0_1 = arith.constant 0 : index
    %c0_2 = arith.constant 0 : index
    %2 = vector.load %arg2[%c0_1, %c0_2] : memref<784x256xbf16, #tpu.memory_space<vmem>>, vector<784x256xbf16>
    %cst = arith.constant dense<0.000000e+00> : vector<64x256xf32>
    %3 = tpu.matmul %1, %2, %cst {dimension_numbers = #tpu.dot_dimension_numbers<[1], [0], [0], [1], [0, 0, 1, 1], [], []>} : vector<64x784xbf16>, vector<784x256xbf16>, vector<64x256xf32> -> vector<64x256xf32>
    %c0_3 = arith.constant 0 : index
    %c0_4 = arith.constant 0 : index
    %4 = vector.load %arg3[%c0_3, %c0_4] : memref<1x256xf32, #tpu.memory_space<vmem>>, vector<1x256xf32>
    %5 = vector.broadcast %4 : vector<1x256xf32> to vector<64x256xf32>
    %6 = arith.addf %3, %5 : vector<64x256xf32>
    %cst_5 = arith.constant 0.000000e+00 : f32
    %7 = vector.broadcast %cst_5 : f32 to vector<64x256xf32>
    %8 = arith.maximumf %6, %7 : vector<64x256xf32>
    %9 = arith.truncf %8 : vector<64x256xf32> to vector<64x256xbf16>
    %c0_6 = arith.constant 0 : index
    %c0_7 = arith.constant 0 : index
    %10 = vector.load %arg4[%c0_6, %c0_7] : memref<256x128xbf16, #tpu.memory_space<vmem>>, vector<256x128xbf16>
    %cst_8 = arith.constant dense<0.000000e+00> : vector<64x128xf32>
    %11 = tpu.matmul %9, %10, %cst_8 {dimension_numbers = #tpu.dot_dimension_numbers<[1], [0], [0], [1], [0, 0, 1, 1], [], []>} : vector<64x256xbf16>, vector<256x128xbf16>, vector<64x128xf32> -> vector<64x128xf32>
    %c0_9 = arith.constant 0 : index
    %c0_10 = arith.constant 0 : index
    %12 = vector.load %arg5[%c0_9, %c0_10] : memref<1x128xf32, #tpu.memory_space<vmem>>, vector<1x128xf32>
    %13 = vector.broadcast %12 : vector<1x128xf32> to vector<64x128xf32>
    %14 = arith.addf %11, %13 : vector<64x128xf32>
    %cst_11 = arith.constant 0.000000e+00 : f32
    %15 = vector.broadcast %cst_11 : f32 to vector<64x128xf32>
    %16 = arith.maximumf %14, %15 : vector<64x128xf32>
    %17 = arith.truncf %16 : vector<64x128xf32> to vector<64x128xbf16>
    %c0_12 = arith.constant 0 : index
    %c0_13 = arith.constant 0 : index
    %18 = vector.load %arg6[%c0_12, %c0_13] : memref<128x128xbf16, #tpu.memory_space<vmem>>, vector<128x128xbf16>
    %cst_14 = arith.constant dense<0.000000e+00> : vector<64x128xf32>
    %19 = tpu.matmul %17, %18, %cst_14 {dimension_numbers = #tpu.dot_dimension_numbers<[1], [0], [0], [1], [0, 0, 1, 1], [], []>} : vector<64x128xbf16>, vector<128x128xbf16>, vector<64x128xf32> -> vector<64x128xf32>
    %c0_15 = arith.constant 0 : index
    %c0_16 = arith.constant 0 : index
    %20 = vector.load %arg7[%c0_15, %c0_16] : memref<1x128xf32, #tpu.memory_space<vmem>>, vector<1x128xf32>
    %21 = vector.broadcast %20 : vector<1x128xf32> to vector<64x128xf32>
    %22 = arith.addf %19, %21 : vector<64x128xf32>
    %cst_17 = arith.constant 0.000000e+00 : f32
    %23 = vector.broadcast %cst_17 : f32 to vector<64x128xf32>
    %24 = arith.maximumf %22, %23 : vector<64x128xf32>
    %25 = arith.truncf %24 : vector<64x128xf32> to vector<64x128xbf16>
    %c0_18 = arith.constant 0 : index
    %c0_19 = arith.constant 0 : index
    %26 = vector.load %arg8[%c0_18, %c0_19] : memref<128x128xbf16, #tpu.memory_space<vmem>>, vector<128x128xbf16>
    %cst_20 = arith.constant dense<0.000000e+00> : vector<64x128xf32>
    %27 = tpu.matmul %25, %26, %cst_20 {dimension_numbers = #tpu.dot_dimension_numbers<[1], [0], [0], [1], [0, 0, 1, 1], [], []>} : vector<64x128xbf16>, vector<128x128xbf16>, vector<64x128xf32> -> vector<64x128xf32>
    %c0_21 = arith.constant 0 : index
    %c0_22 = arith.constant 0 : index
    %28 = vector.load %arg9[%c0_21, %c0_22] : memref<1x128xf32, #tpu.memory_space<vmem>>, vector<1x128xf32>
    %29 = vector.broadcast %28 : vector<1x128xf32> to vector<64x128xf32>
    %30 = arith.addf %27, %29 : vector<64x128xf32>
    %31 = arith.truncf %30 : vector<64x128xf32> to vector<64x128xbf16>
    %c0_23 = arith.constant 0 : index
    %c0_24 = arith.constant 0 : index
    %32 = vector.load %arg10[%c0_23, %c0_24] : memref<64x128xbf16, #tpu.memory_space<vmem>>, vector<64x128xbf16>
    tpu.vector_store %arg10[%c0_23, %c0_24], %31 {strides = array<i32>} : memref<64x128xbf16, #tpu.memory_space<vmem>>, vector<64x128xbf16>,
    return
  }
  func.func @transform_0(%arg0: i32) -> (i32, i32) {
    %c0_i32 = arith.constant 0 : i32
    %c0_i32_0 = arith.constant 0 : i32
    return %arg0, %c0_i32 : i32, i32
  }
  func.func @transform_1(%arg0: i32) -> (i32, i32) {
    %c0_i32 = arith.constant 0 : i32
    %c0_i32_0 = arith.constant 0 : i32
    %c0_i32_1 = arith.constant 0 : i32
    return %c0_i32, %c0_i32_0 : i32, i32
  }
  func.func @transform_2(%arg0: i32) -> (i32, i32) {
    %c0_i32 = arith.constant 0 : i32
    %c0_i32_0 = arith.constant 0 : i32
    %c0_i32_1 = arith.constant 0 : i32
    return %c0_i32, %c0_i32_0 : i32, i32
  }
  func.func @transform_3(%arg0: i32) -> (i32, i32) {
    %c0_i32 = arith.constant 0 : i32
    %c0_i32_0 = arith.constant 0 : i32
    %c0_i32_1 = arith.constant 0 : i32
    return %c0_i32, %c0_i32_0 : i32, i32
  }
  func.func @transform_4(%arg0: i32) -> (i32, i32) {
    %c0_i32 = arith.constant 0 : i32
    %c0_i32_0 = arith.constant 0 : i32
    %c0_i32_1 = arith.constant 0 : i32
    return %c0_i32, %c0_i32_0 : i32, i32
  }
  func.func @transform_5(%arg0: i32) -> (i32, i32) {
    %c0_i32 = arith.constant 0 : i32
    %c0_i32_0 = arith.constant 0 : i32
    %c0_i32_1 = arith.constant 0 : i32
    return %c0_i32, %c0_i32_0 : i32, i32
  }
  func.func @transform_6(%arg0: i32) -> (i32, i32) {
    %c0_i32 = arith.constant 0 : i32
    %c0_i32_0 = arith.constant 0 : i32
    %c0_i32_1 = arith.constant 0 : i32
    return %c0_i32, %c0_i32_0 : i32, i32
  }
  func.func @transform_7(%arg0: i32) -> (i32, i32) {
    %c0_i32 = arith.constant 0 : i32
    %c0_i32_0 = arith.constant 0 : i32
    %c0_i32_1 = arith.constant 0 : i32
    return %c0_i32, %c0_i32_0 : i32, i32
  }
  func.func @transform_8(%arg0: i32) -> (i32, i32) {
    %c0_i32 = arith.constant 0 : i32
    %c0_i32_0 = arith.constant 0 : i32
    %c0_i32_1 = arith.constant 0 : i32
    return %c0_i32, %c0_i32_0 : i32, i32
  }
  func.func @transform_9(%arg0: i32) -> (i32, i32) {
    %c0_i32 = arith.constant 0 : i32
    %c0_i32_0 = arith.constant 0 : i32
    return %arg0, %c0_i32 : i32, i32
  }
}

</mosaic_0001>

<bundles_post_ra>
// kernel: tpu_custom_call.1
= control target key start
LH: loop header
LB: loop body
LE: loop exit
PB: predicated region body
PF: predicated region fallthrough
CT: control target
= control target key end

     0   :  { %s3373_s0 = inlined_call_operand.hbm [shape: f32[100,784], index: 0, kind: input, shape index: {}]   ;;  %s3374_s1 = inlined_call_operand.hbm [shape: bf16[784,256], index: 1, kind: input, shape index: {}]   ;;  %s3375_s2 = inlined_call_operand.vmem [shape: f32[1,256], index: 2, kind: input, shape index: {}]   ;;  %s3376_s3 = inlined_call_operand.hbm [shape: bf16[256,128], index: 3, kind: input, shape index: {}]   ;;  %s3377_s4 = inlined_call_operand.vmem [shape: f32[1,128], index: 4, kind: input, shape index: {}]   ;;  %s3378_s5 = inlined_call_operand.hbm [shape: bf16[128,128], index: 5, kind: input, shape index: {}]   ;;  %s3379_s6 = inlined_call_operand.vmem [shape: f32[1,128], index: 6, kind: input, shape index: {}]   ;;  %s3380_s7 = inlined_call_operand.hbm [shape: bf16[128,128], index: 7, kind: input, shape index: {}]   ;;  %s3381_s8 = inlined_call_operand.vmem [shape: f32[1,128], index: 8, kind: input, shape index: {}]   ;;  %s3382_s9 = inlined_call_operand.hbm [shape: bf16[100,128], index: 9, kind: output, shape index: {}]  }
   0x1   :  { %3385 = sst [smem:[#allocation17_spill]] %s3374_s1 }
   0x2   :  { %3386 = sst [smem:[#allocation18_spill]] %s3376_s3 }
   0x3   :  { %14 = vsyncpa [#allocation3], 0 }
   0x4   :  { %16 = vsyncpa [#allocation3 + $0x1], 0 }
   0x5   :  { %17 = vsyncpa [#allocation6], 0 }
   0x6   :  { %18 = vsyncpa [#allocation9], 0 }
   0x7   :  { %19 = vsyncpa [#allocation4], 0 }
   0x8   :  { %21 = vsyncpa [#allocation4 + $0x1], 0  ;;  %s2967_s30 = smov 0   ;;  %s2969_s10 = smov 0  }
   0x9   :  { %s2971_s11 = smov 0   ;;  %s2973_s12 = smov 0  }
   0xa LB: > { %s2988_s13 = sadd.s32 4294967295, %s2900_s12   ;;  %s2109_s14 = sadd.s32 4294967294, %s2900_s12   ;;  %s2900_s12 = sphi %s2973_s12, %s3407_s12   ;;  %s2896_s11 = sphi %s2971_s11, %s3406_s11   ;;  %s2892_s10 = sphi %s2969_s10, %s3405_s10   ;;  %s2888_s30 = sphi %s2967_s30, %s3404_s30  }
   0xb   : > { %s2992_s15 = sadd.s32 1, %s2900_s12   ;;  %s34_s16 = sadd.s32 1, %s2896_s11 }
   0xc   : > { %s31_s17 = ssub.s32 %s2900_s12, %s2992_s15  ;;  %p41_p0 = scmp.ne.s32.totalorder %s2896_s11, %s2892_s10 }
   0xd   : > { %p32_p1 = scmp.eq.s32.totalorder %s31_s17, 0  ;;  %p42_p2 = scmp.eq.s32.totalorder %s2900_s12, 0 }
   0xe   : > { %p47_p3 = scmp.ne.s32.totalorder %s2892_s10, %s2888_s30  ;;  %p3383_p4 = scmp.eq.s32.totalorder %s2988_s13, 0 }
   0xf   : > { %s3004_s18 = scalar_select %p32_p1, %s2896_s11, %s34_s16  }
  0x10   : > { %p3006_p5 = por %p42_p2, %p41_p0  ;;  %p3012_p6 = por %p3383_p4, %p47_p3 }
  0x11   : > { %3387 = sst [smem:[#allocation16_spill]] %s3004_s18  ;;  %p239_p7 = scmp.eq.s32.totalorder %s2988_s13, 1 }
  0x12   : > { %p245_p8 = scmp.eq.s32.totalorder %s2109_s14, 1  ;;  %p2110_p9 = scmp.ge.s32.totalorder %s2900_s12, 1 }
  0x13   : > { %p252_p10 = scmp.lt.s32.totalorder %s2900_s12, 3  ;;  %p3019_p11 = por %p239_p7, %p41_p0 }
  0x14   : > { %p3023_p12 = por %p245_p8, %p47_p3  ;;  %s2902_s24 = smov [#allocation5]  }
  0x15   : > { %s3390_s21 = scalar_select %p3019_p11, 1, 0 }
  0x16   : > { %s3391_s22 = scalar_select %p3023_p12, 1, 0 }
  0x17   : > { %p3027_p13 = pnand %p2110_p9, %p252_p10  ;;  %s264_s25 = sshll.u32 %s2902_s24, 4  ;;  %s265_s25 = int_to_ptr.vmem [resolvable:$true] %s264_s25 }
  0x18   : > { %s2903_s27 = smov [#allocation8]   ;;  %s2709_s29 = scalar_lea.vmem %s265_s25, 12544 }
  0x19   : > { %p2448_p1 = pneg %p3027_p13  ;;  %s296_s28 = sshll.u32 %s2903_s27, 4  ;;  %s297_s28 = int_to_ptr.vmem [resolvable:$true] %s296_s28 }
  0x1a   : > { %p2710_p3 = scmp.ne.s32.totalorder %s265_s25, %s2709_s29  ;;  %p2717_p9 = scmp.lt.s32.totalorder %s265_s25, %s265_s25 }
  0x1b   : > { %p3035_p2 = pnand %p2448_p1, %p3383_p4  ;;  %p2718_p10 = scmp.lt.s32.totalorder %s2709_s29, %s2709_s29 }
  0x1d   : > { %p2700_p0 = pneg %p3035_p2  ;;  %p2719_p12 = por %p2718_p10, %p2717_p9 }
  0x1f   : > { %p2712_p7 = pnand %p2710_p3, %p2700_p0 }
  0x21   : > { %p2713_p8 = pneg %p2712_p7 }
  0x23   : > { %p2720_p11 = pnand %p2719_p12, %p2713_p8 }
  0x25   : > { %2723 = shalt.err (!%p2720_p11)
}
  0x26   : > { %s2904_s14 = smov 128   ;;  %s2905_s16 = smov 8  }
  0x27   : > { %s3394_s1 = sld [smem:[#allocation17_spill]]  ;;  %s2735_s27 = scalar_lea.vmem %s297_s28, 1024 }
  0x28   : > { %p2736_p1 = scmp.ne.s32.totalorder %s297_s28, %s2735_s27  ;;  %p2743_p4 = scmp.lt.s32.totalorder %s297_s28, %s297_s28 }
  0x29   : > { %p2744_p9 = scmp.lt.s32.totalorder %s2735_s27, %s2735_s27 }
  0x2a   : > { %p2738_p3 = pnand %p2736_p1, %p2700_p0 }
  0x2b   : > { %p2745_p12 = por %p2744_p9, %p2743_p4 }
  0x2c   : > { %p2739_p7 = pneg %p2738_p3 }
  0x2d   : > { %2451 = dma.hbm_to_vmem [thread:$0]  (!%p3035_p2), %s3394_s1, 12544, %s265_s25, [#allocation6], %s2904_s14, %s2904_s14, %s2905_s16  }
  0x2e   : > { %p2746_p11 = pnand %p2745_p12, %p2739_p7 }
  0x30   : > { %2749 = shalt.err (!%p2746_p11)
}
  0x31   : > { %s2906_s29 = smov 64   ;;  %s2907_s18 = smov 4  }
  0x32   : > { %2457 = dma.hbm_to_vmem [thread:$0]  (!%p3035_p2), %s3378_s5, 1024, %s297_s28, [#allocation9], %s2906_s29, %s2906_s29, %s2907_s18  }
  0x33   : > { %s2908_s16 = smov [#allocation7]   ;;  %s2909_s24 = smov [#allocation10]  }
  0x34   : > { %s280_s17 = sshll.u32 %s2908_s16, 4  ;;  %s312_s27 = sshll.u32 %s2909_s24, 4  ;;  %s281_s17 = int_to_ptr.vmem [resolvable:$true] %s280_s17  ;;  %s313_s27 = int_to_ptr.vmem [resolvable:$true] %s312_s27 }
  0x35   : > { %s2761_s1 = scalar_lea.vmem %s281_s17, 2048  ;;  %p2769_p1 = scmp.lt.s32.totalorder %s281_s17, %s281_s17 }
  0x36   : > { %p2762_p4 = scmp.ne.s32.totalorder %s281_s17, %s2761_s1  ;;  %p2770_p3 = scmp.lt.s32.totalorder %s2761_s1, %s2761_s1 }
  0x38   : > { %p2764_p8 = pnand %p2762_p4, %p2700_p0  ;;  %p2771_p7 = por %p2770_p3, %p2769_p1 }
  0x3a   : > { %p2765_p10 = pneg %p2764_p8 }
  0x3c   : > { %p2772_p9 = pnand %p2771_p7, %p2765_p10 }
  0x3e   : > { %2775 = shalt.err (!%p2772_p9)
}
  0x3f   : > { %s3395_s3 = sld [smem:[#allocation18_spill]]  ;;  %s2787_s14 = scalar_lea.vmem %s313_s27, 1024 }
  0x40   : > { %p2788_p12 = scmp.ne.s32.totalorder %s313_s27, %s2787_s14  ;;  %p2795_p8 = scmp.lt.s32.totalorder %s313_s27, %s313_s27 }
  0x41   : > { %p2796_p10 = scmp.lt.s32.totalorder %s2787_s14, %s2787_s14 }
  0x42   : > { %p2790_p11 = pnand %p2788_p12, %p2700_p0 }
  0x43   : > { %p2797_p1 = por %p2796_p10, %p2795_p8 }
  0x44   : > { %p2791_p4 = pneg %p2790_p11 }
  0x45   : > { %2454 = dma.hbm_to_vmem [thread:$0]  (!%p3035_p2), %s3395_s3, 2048, %s281_s17, [#allocation6], %s2906_s29, %s2906_s29, %s2907_s18  }
  0x46   : > { %p2798_p3 = pnand %p2797_p1, %p2791_p4 }
  0x48   : > { %2801 = shalt.err (!%p2798_p3)
}
  0x49   : > { %2460 = dma.hbm_to_vmem [thread:$0]  (!%p3035_p2), %s3380_s7, 1024, %s313_s27, [#allocation9], %s2906_s29, %s2906_s29, %s2907_s18  }
  0x4a   : > { %p3384_p7 = scmp.ge.s32.totalorder %s2900_s12, 2 }
  0x4c   : > { %325 = sbr.rel (%p3384_p7) target bundleno = 115 (0x73), region = 48 }
  0x51   : > { %328 = sbr.rel (!%p3006_p5) target bundleno = 115 (0x73), region = 52  ;;  %s329_s17 = sand.u32 (%p3006_p5), 1, %s2896_s11  }
  0x52   : > { %s2116_s24 = sshll.u32 (%p3006_p5), %s2900_s12, 3  ;;  %s2427_s26 = smul.u32 (%p3006_p5), 448, %s329_s17 }
  0x53   : > { %s335_s28 = ssub.s32 (%p3006_p5), 13, %s2116_s24  ;;  %s3092_s29 = scalar_lea.sflag (%p3006_p5), [#allocation3], %s329_s17 }
  0x54   : > { %p336_p0 = scmp.lt.s32.totalorder (%p3006_p5), %s335_s28, 8  ;;  %s333_s27 = scalar_lea.vmem (%p3006_p5), [#allocation2], %s2427_s26 }
  0x56   : > { %s3409_s28 = smov (!%p336_p0, %s335_s28), 8 }
  0x57   : > { %s3089_s25 = smul.u32 896, %s3409_s28 }
  0x59   : > { %s341_s18 = ssub.s32 7168, %s3089_s25 }
  0x5a   : > { %342 = vsyncadd %s3092_s29, %s341_s18  ;;  %p2119_p5 = scmp.ne.s32.totalorder %s3089_s25, 0  ;;  %s2428_s19 = smul.u32 7168, %s2900_s12 }
  0x5b   : > { %s348_s14 = sshll.u32 %s333_s27, 4  ;;  %s2806_s18 = scalar_lea.hbm %s3373_s0, 11648  ;;  %s3102_s14 = int_to_ptr.vmem [resolvable:$true] %s348_s14 }
  0x5c   : > { %s3100_s24 = scalar_lea.hbm %s3373_s0, %s2428_s19 }
  0x5d   : > { %s2802_s17 = scalar_lea.hbm %s3100_s24, %s3089_s25  ;;  %p2807_p11 = scmp.lt.s32.totalorder %s3100_s24, %s3373_s0 }
  0x5e   : > { %p2803_p2 = scmp.ne.s32.totalorder %s3100_s24, %s2802_s17  ;;  %p2808_p4 = scmp.lt.s32.totalorder %s2806_s18, %s2802_s17 }
  0x60   : > { %p2804_p9 = pnand %p2803_p2, %p2119_p5  ;;  %p2809_p8 = por %p2808_p4, %p2807_p11 }
  0x62   : > { %p2805_p12 = pneg %p2804_p9 }
  0x64   : > { %p2810_p10 = pnand %p2809_p8, %p2805_p12 }
  0x66   : > { %2813 = shalt.err (!%p2810_p10)
}
  0x67   : > { %s2814_s19 = scalar_lea.vmem %s3102_s14, %s3089_s25  ;;  %s2910_s1 = smov [#allocation2]  }
  0x68   : > { %p2815_p1 = scmp.ne.s32.totalorder %s3102_s14, %s2814_s19  ;;  %s2818_s16 = sshll.u32 %s2910_s1, 4  ;;  %s2819_s16 = int_to_ptr.vmem [resolvable:$false] %s2818_s16 }
  0x69   : > { %s2820_s26 = scalar_lea.vmem %s2819_s16, 14336  ;;  %p2821_p2 = scmp.lt.s32.totalorder %s3102_s14, %s2819_s16 }
  0x6a   : > { %p2816_p3 = pnand %p2815_p1, %p2119_p5  ;;  %p2822_p9 = scmp.lt.s32.totalorder %s2820_s26, %s2814_s19 }
  0x6c   : > { %p2817_p0 = pneg %p2816_p3  ;;  %p2823_p7 = por %p2822_p9, %p2821_p2 }
  0x6e   : > { %p2824_p11 = pnand %p2823_p7, %p2817_p0 }
  0x70   : > { %2827 = shalt.err (!%p2824_p11)
}
  0x71   : > { %s2911_s3 = smov 896   ;;  %s2912_s17 = smov 56  }
  0x72   : > { %354 = dma.hbm_to_vmem [thread:$0]  (%p2119_p5), %s3100_s24, %s3089_s25, %s3102_s14, %s3092_s29, %s2911_s3, %s2911_s3, %s2912_s17  }
  0x73 PF: > { %360 = sbr.rel (%p3027_p13) target bundleno = 1132 (0x46c), region = 56  ;;  %s3131_s28 = sand.u32 (!%p3027_p13), 1, %s2892_s10  }
  0x74   : > { %s2429_s18 = smul.u32 (!%p3027_p13), 448, %s3131_s28  ;;  %s363_s27 = scalar_lea.sflag (!%p3027_p13), [#allocation3], %s3131_s28 }
  0x76   : > { %s3135_s19 = scalar_lea.vmem (!%p3027_p13), [#allocation2], %s2429_s18 }
  0x78   : > { %2871 = dma.done.wait (%p3012_p6), %s363_s27, 7168  }
  0x79   : > { %2873 = vsyncadd (%p3012_p6), %s363_s27, 4294960128  ;;  %p3396_p7 = scmp.eq.s32.totalorder %s2988_s13, 0 }
  0x7b   : > { %2875 = dma.done.wait (%p3396_p7), [#allocation6], 14592   ;;  %p3397_p13 = pmov %p3396_p7 }
  0x7c   : > { %p3398_p5 = pmov %p3396_p7 }
  0x7d   : > { %2877 = vsyncadd (%p3397_p13), [#allocation6], 4294952704 }
  0x7e   : > { %2879 = dma.done.wait (%p3398_p5), [#allocation9], 2048   ;;  %p3399_p12 = pmov %p3398_p5 }
  0x7f   : > { %v2519_v0 = vld [vmem:[#allocation5 + $0x74] ss:$8 sps:$4 sm:$0xff]   ;;  %v2521_v1 = vld [vmem:[#allocation5 + $0x70] ss:$8 sps:$4 sm:$0xff]   ;;  %v2525_v4 = vld [vmem:[#allocation5 + $0x64] ss:$8 sps:$4 sm:$0xff]  }
  0x80   : > { %2881 = vsyncadd (%p3399_p12), [#allocation9], 4294965248  ;;  %1126 = vmatprep.subr.bf16.mxu0 %v2519_v0  ;;  %v2522_v2 = vld [vmem:[#allocation5 + $0x174] ss:$8 sps:$4 sm:$0xff]   ;;  %v2524_v3 = vld [vmem:[#allocation5 + $0x170] ss:$8 sps:$4 sm:$0xff]  }
  0x81   : > { %1127 = vmatpush1.bf16.msra.mxu0 %v2521_v1  ;;  %v2527_v5 = vld [vmem:[#allocation5 + $0x60] ss:$8 sps:$4 sm:$0xff]   ;;  %1199 = vmatprep.subr.bf16.mxu1 %v2522_v2  ;;  %v2528_v6 = vld [vmem:[#allocation5 + $0x164] ss:$8 sps:$4 sm:$0xff]   ;;  %v2531_v8 = vld [vmem:[#allocation5 + $0x54] ss:$8 sps:$4 sm:$0xff]  }
  0x82   : > { %1200 = vmatpush1.bf16.msra.mxu1 %v2524_v3  ;;  %1128 = vmatprep.subr.bf16.mxu0 %v2525_v4  ;;  %v2530_v7 = vld [vmem:[#allocation5 + $0x160] ss:$8 sps:$4 sm:$0xff]   ;;  %v2533_v9 = vld [vmem:[#allocation5 + $0x50] ss:$8 sps:$4 sm:$0xff]   ;;  %v2534_v10 = vld [vmem:[#allocation5 + $0x154] ss:$8 sps:$4 sm:$0xff]  }
  0x83   : > { %1201 = vmatprep.subr.bf16.mxu1 %v2528_v6  ;;  %v2537_v11 = vld [vmem:[#allocation5 + $0x44] ss:$8 sps:$4 sm:$0xff]   ;;  %v2536_v12 = vld [vmem:[#allocation5 + $0x150] ss:$8 sps:$4 sm:$0xff]   ;;  %v2539_v14 = vld [vmem:[#allocation5 + $0x40] ss:$8 sps:$4 sm:$0xff]  }
  0x84   : > { %v2540_v13 = vld [vmem:[#allocation5 + $0x144] ss:$8 sps:$4 sm:$0xff]   ;;  %v2543_v15 = vld [vmem:[#allocation5 + $0x34] ss:$8 sps:$4 sm:$0xff]   ;;  %v2542_v16 = vld [vmem:[#allocation5 + $0x140] ss:$8 sps:$4 sm:$0xff]  }
  0x85   : > { %1129 = vmatpush1.bf16.msra.mxu0 %v2527_v5  ;;  %v2546_v17 = vld [vmem:[#allocation5 + $0x134] ss:$8 sps:$4 sm:$0xff]   ;;  %v2545_v18 = vld [vmem:[#allocation5 + $0x30] ss:$8 sps:$4 sm:$0xff]   ;;  %v2549_v19 = vld [vmem:[#allocation5 + $0x24] ss:$8 sps:$4 sm:$0xff]  }
  0x86   : > { %1130 = vmatprep.subr.bf16.mxu0 %v2531_v8  ;;  %1202 = vmatpush1.bf16.msra.mxu1 %v2530_v7  ;;  %v2548_v20 = vld [vmem:[#allocation5 + $0x130] ss:$8 sps:$4 sm:$0xff]   ;;  %v2552_v21 = vld [vmem:[#allocation5 + $0x124] ss:$8 sps:$4 sm:$0xff]   ;;  %v2551_v22 = vld [vmem:[#allocation5 + $0x20] ss:$8 sps:$4 sm:$0xff]  }
  0x87   : > { %1203 = vmatprep.subr.bf16.mxu1 %v2534_v10  ;;  %v2555_v23 = vld [vmem:[#allocation5 + $0x14] ss:$8 sps:$4 sm:$0xff]   ;;  %v2554_v24 = vld [vmem:[#allocation5 + $0x120] ss:$8 sps:$4 sm:$0xff]   ;;  %v2557_v26 = vld [vmem:[#allocation5 + $0x10] ss:$8 sps:$4 sm:$0xff]  }
  0x88   : > { %v2558_v25 = vld [vmem:[#allocation5 + $0x114] ss:$8 sps:$4 sm:$0xff]   ;;  %v2561_v27 = vld [vmem:[#allocation5 + $0x4] ss:$8 sps:$4 sm:$0xff]   ;;  %v2560_v28 = vld [vmem:[#allocation5 + $0x110] ss:$8 sps:$4 sm:$0xff]  }
  0x89   : > { %1131 = vmatpush1.bf16.msra.mxu0 %v2533_v9  ;;  %v2564_v29 = vld [vmem:[#allocation5 + $0x104] ss:$8 sps:$4 sm:$0xff]   ;;  %v2563_v30 = vld [vmem:[#allocation5] ss:$8 sps:$4 sm:$0xff]   ;;  %v2567_v31 = vld [vmem:[#allocation5 + $0xf4] ss:$8 sps:$4 sm:$0xff]  }
  0x8a   : > { %1132 = vmatprep.subr.bf16.mxu0 %v2537_v11  ;;  %1204 = vmatpush1.bf16.msra.mxu1 %v2536_v12  ;;  %v2566_v32 = vld [vmem:[#allocation5 + $0x100] ss:$8 sps:$4 sm:$0xff]   ;;  %v2570_v33 = vld [vmem:[#allocation5 + $0x1f4] ss:$8 sps:$4 sm:$0xff]   ;;  %v2569_v34 = vld [vmem:[#allocation5 + $0xf0] ss:$8 sps:$4 sm:$0xff]  }
  0x8b   : > { %1205 = vmatprep.subr.bf16.mxu1 %v2540_v13  ;;  %v2573_v35 = vld [vmem:[#allocation5 + $0xe4] ss:$8 sps:$4 sm:$0xff]   ;;  %v2572_v36 = vld [vmem:[#allocation5 + $0x1f0] ss:$8 sps:$4 sm:$0xff]   ;;  %v2575_v38 = vld [vmem:[#allocation5 + $0xe0] ss:$8 sps:$4 sm:$0xff]  }
  0x8c   : > { %v2576_v37 = vld [vmem:[#allocation5 + $0x1e4] ss:$8 sps:$4 sm:$0xff]   ;;  %v2579_v39 = vld [vmem:[#allocation5 + $0xd4] ss:$8 sps:$4 sm:$0xff]   ;;  %v2578_v40 = vld [vmem:[#allocation5 + $0x1e0] ss:$8 sps:$4 sm:$0xff]  }
  0x8d   : > { %1133 = vmatpush1.bf16.msra.mxu0 %v2539_v14  ;;  %v2582_v41 = vld [vmem:[#allocation5 + $0x1d4] ss:$8 sps:$4 sm:$0xff]   ;;  %v2581_v42 = vld [vmem:[#allocation5 + $0xd0] ss:$8 sps:$4 sm:$0xff]   ;;  %v2585_v43 = vld [vmem:[#allocation5 + $0xc4] ss:$8 sps:$4 sm:$0xff]  }
  0x8e   : > { %1134 = vmatprep.subr.bf16.mxu0 %v2543_v15  ;;  %1206 = vmatpush1.bf16.msra.mxu1 %v2542_v16  ;;  %v2584_v44 = vld [vmem:[#allocation5 + $0x1d0] ss:$8 sps:$4 sm:$0xff]   ;;  %v2588_v45 = vld [vmem:[#allocation5 + $0x1c4] ss:$8 sps:$4 sm:$0xff]   ;;  %v2587_v48 = vld [vmem:[#allocation5 + $0xc0] ss:$8 sps:$4 sm:$0xff]  }
  0x8f   : > { %1207 = vmatprep.subr.bf16.mxu1 %v2546_v17  ;;  %v430_v46 = vld [vmem:[%s3135_s19 + $0x8] sm:$0xff]  ;;  %v437_v47 = vld [vmem:[%s3135_s19 + $0x40] sm:$0xff]  ;;  %v2591_v50 = vld [vmem:[#allocation5 + $0xb4] ss:$8 sps:$4 sm:$0xff]   ;;  %vm1113_vm0 = vcmask 130048   ;;  %s2128_s26 = sshll.u32 %s3131_s28, 5 }
  0x90   : > { %v486_v49 = vpack.c.bf16 %v437_v47, %v430_v46  ;;  %v2590_v51 = vld [vmem:[#allocation5 + $0x1c0] ss:$8 sps:$4 sm:$0xff]   ;;  %v432_v52 = vld [vmem:[%s3135_s19 + $0x18] sm:$0xff]  ;;  %v439_v53 = vld [vmem:[%s3135_s19 + $0x50] sm:$0xff]  ;;  %s3305_s3 = scalar_lea.vmem [#allocation11], %s2128_s26  ;;  %s1979_s17 = scalar_lea.sflag [#allocation4], %s3131_s28 }
  0x91   : > { %1135 = vmatpush1.bf16.msra.mxu0 %v2545_v18  ;;  %v2594_v54 = vld [vmem:[#allocation5 + $0x1b4] ss:$8 sps:$4 sm:$0xff]   ;;  %v488_v55 = vpack.c.bf16 %v439_v53, %v432_v52  ;;  %v2593_v56 = vld [vmem:[#allocation5 + $0xb0] ss:$8 sps:$4 sm:$0xff]   ;;  %v2597_v57 = vld [vmem:[#allocation5 + $0xa4] ss:$8 sps:$4 sm:$0xff]  }
  0x92   : > { %1136 = vmatprep.subr.bf16.mxu0 %v2549_v19  ;;  %1208 = vmatpush1.bf16.msra.mxu1 %v2548_v20  ;;  %v2596_v58 = vld [vmem:[#allocation5 + $0x1b0] ss:$8 sps:$4 sm:$0xff]   ;;  %v2600_v59 = vld [vmem:[#allocation5 + $0x1a4] ss:$8 sps:$4 sm:$0xff]   ;;  %v2599_v60 = vld [vmem:[#allocation5 + $0xa0] ss:$8 sps:$4 sm:$0xff]  }
  0x93   : > { %1209 = vmatprep.subr.bf16.mxu1 %v2552_v21  ;;  %1158 = vmatprep.mubr.bf16.mxu0 %v486_v49  ;;  %v2603_v61 = vld [vmem:[#allocation5 + $0x94] ss:$8 sps:$4 sm:$0xff]   ;;  %v2602_v62 = vld [vmem:[#allocation5 + $0x1a0] ss:$8 sps:$4 sm:$0xff]   ;;  %v2605_v0 = vld [vmem:[#allocation5 + $0x90] ss:$8 sps:$4 sm:$0xff]  }
  0x94   : > { %1231 = vmatprep.mubr.bf16.mxu1 %v488_v55  ;;  %v2606_v63 = vld [vmem:[#allocation5 + $0x194] ss:$8 sps:$4 sm:$0xff]   ;;  %v2609_v1 = vld [vmem:[#allocation5 + $0x84] ss:$8 sps:$4 sm:$0xff]   ;;  %v2608_v2 = vld [vmem:[#allocation5 + $0x190] ss:$8 sps:$4 sm:$0xff]  }
  0x95   : > { %1137 = vmatpush1.bf16.msra.mxu0 %v2551_v22  ;;  %v2611_v3 = vld [vmem:[#allocation5 + $0x80] ss:$8 sps:$4 sm:$0xff]   ;;  %v2612_v4 = vld [vmem:[#allocation5 + $0x184] ss:$8 sps:$4 sm:$0xff]   ;;  %v436_v7 = vld [vmem:[%s3135_s19 + $0x38] sm:$0xff]  ;;  %p3400_p6 = scmp.ne.s32.totalorder %s3390_s21, 0 }
  0x96   : > { %1138 = vmatprep.subr.bf16.mxu0 %v2555_v23  ;;  %1210 = vmatpush1.bf16.msra.mxu1 %v2554_v24  ;;  %v429_v5 = vld [vmem:[%s3135_s19] sm:$0xff]  ;;  %v2617_v8 = vld [vmem:[#allocation5 + $0x274] ss:$8 sps:$4 sm:$0xff]   ;;  %v438_v10 = vld [vmem:[%s3135_s19 + $0x48] sm:$0xff]  ;;  %s2275_s18 = sshll.u32 (%p3400_p6), %s2988_s13, 3 }
  0x97   : > { %1211 = vmatprep.subr.bf16.mxu1 %v2558_v25  ;;  %v2614_v6 = vld [vmem:[#allocation5 + $0x180] ss:$8 sps:$4 sm:$0xff]   ;;  %v431_v9 = vld [vmem:[%s3135_s19 + $0x10] sm:$0xff]  ;;  %v444_v11 = vld [vmem:[%s3135_s19 + $0x78] sm:$0xff]  ;;  %v485_v14 = vpack.c.bf16 %v436_v7, %v429_v5  ;;  %s1987_s27 = ssub.s32 (%p3400_p6), 13, %s2275_s18 }
  0x98   : > { %v451_v12 = vld [vmem:[%s3135_s19 + $0xb0] sm:$0xff]  ;;  %v2644_v13 = vld [vmem:[#allocation5 + $0x304] ss:$8 sps:$4 sm:$0xff]   ;;  %v487_v19 = vpack.c.bf16 %v438_v10, %v431_v9  ;;  %v2618_v21 = vld [vmem:[#allocation5 + $0x260] ss:$8 sps:$4 sm:$0xff]   ;;  %v2913_v9 = vmov 0  }
  0x99   : > { %1139 = vmatpush1.bf16.msra.mxu0 %v2557_v26  ;;  %v446_v15 = vld [vmem:[%s3135_s19 + $0x88] sm:$0xff]  ;;  %v453_v16 = vld [vmem:[%s3135_s19 + $0xc0] sm:$0xff]  ;;  %v2615_v17 = vld [vmem:[#allocation5 + $0x270] ss:$8 sps:$4 sm:$0xff]   ;;  %v493_v18 = vpack.c.bf16 %v451_v12, %v444_v11  ;;  %p1988_p4 = scmp.lt.s32.totalorder (%p3400_p6), %s1987_s27, 8 }
  0x9a   : > { %1140 = vmatprep.subr.bf16.mxu0 %v2561_v27  ;;  %1212 = vmatpush1.bf16.msra.mxu1 %v2560_v28  ;;  %v2620_v20 = vld [vmem:[#allocation5 + $0x264] ss:$8 sps:$4 sm:$0xff]   ;;  %v2642_v22 = vld [vmem:[#allocation5 + $0x300] ss:$8 sps:$4 sm:$0xff]   ;;  %v495_v23 = vpack.c.bf16 %v453_v16, %v446_v15  ;;  %v2623_v24 = vld [vmem:[#allocation5 + $0x254] ss:$8 sps:$4 sm:$0xff]  }
  0x9b   : > { %1213 = vmatprep.subr.bf16.mxu1 %v2564_v29  ;;  %v443_v25 = vld [vmem:[%s3135_s19 + $0x70] sm:$0xff]  ;;  %v450_v26 = vld [vmem:[%s3135_s19 + $0xa8] sm:$0xff]  ;;  %v465_v28 = vld [vmem:[%s3135_s19 + $0x120] sm:$0xff] }
  0x9c   : > { %v458_v27 = vld [vmem:[%s3135_s19 + $0xe8] sm:$0xff]  ;;  %v445_v29 = vld [vmem:[%s3135_s19 + $0x80] sm:$0xff]  ;;  %v2641_v5 = vld [vmem:[#allocation5 + $0x2f4] ss:$8 sps:$4 sm:$0xff]  }
  0x9d   : > { %1141 = vmatpush1.bf16.msra.mxu0 %v2563_v30  ;;  %v452_v30 = vld [vmem:[%s3135_s19 + $0xb8] sm:$0xff]  ;;  %v466_v46 = vld [vmem:[%s3135_s19 + $0x128] sm:$0xff]  ;;  %v481_v49 = vld [vmem:[%s3135_s19 + $0x1a0] sm:$0xff] }
  0x9e   : > { %1142 = vmatprep.subr.bf16.mxu0 %v2567_v31  ;;  %1214 = vmatpush1.bf16.msra.mxu1 %v2566_v32  ;;  %v492_v31 = vpack.c.bf16 %v450_v26, %v443_v25  ;;  %v460_v32 = vld [vmem:[%s3135_s19 + $0xf8] sm:$0xff]  ;;  %v2632_v52 = vld [vmem:[#allocation5 + $0x224] ss:$8 sps:$4 sm:$0xff]   ;;  %v2645_v12 = vld [vmem:[#allocation5 + $0x2e0] ss:$8 sps:$4 sm:$0xff]  }
  0x9f   : > { %1215 = vmatprep.subr.bf16.mxu1 %v2570_v33  ;;  %v467_v33 = vld [vmem:[%s3135_s19 + $0x130] sm:$0xff]  ;;  %v442_v7 = vld [vmem:[%s3135_s19 + $0x68] sm:$0xff]  ;;  %v456_v15 = vld [vmem:[%s3135_s19 + $0xd8] sm:$0xff] }
  0xa0   : > { %v2647_v10 = vld [vmem:[#allocation5 + $0x2e4] ss:$8 sps:$4 sm:$0xff]   ;;  %v2648_v16 = vld [vmem:[#allocation5 + $0x2d0] ss:$8 sps:$4 sm:$0xff]   ;;  %v2657_v26 = vld [vmem:[#allocation5 + $0x2a0] ss:$8 sps:$4 sm:$0xff]  }
  0xa1   : > { %1143 = vmatpush2.bf16.msra.mxu0 %v2569_v34  ;;  %v2621_v34 = vld [vmem:[#allocation5 + $0x250] ss:$8 sps:$4 sm:$0xff]  }
  0xa2   : > { %1144 = vmatprep.subr.bf16.mxu0 %v2573_v35  ;;  %1216 = vmatpush2.bf16.msra.mxu1 %v2572_v36  ;;  %v500_v35 = vpack.c.bf16 %v465_v28, %v458_v27  ;;  %v2626_v36 = vld [vmem:[#allocation5 + $0x244] ss:$8 sps:$4 sm:$0xff]   ;;  %v2662_v27 = vld [vmem:[#allocation5 + $0x294] ss:$8 sps:$4 sm:$0xff]  }
  0xa3   : > { %1217 = vmatprep.subr.bf16.mxu1 %v2576_v37  ;;  %v494_v37 = vpack.c.bf16 %v452_v30, %v445_v29  ;;  %v477_v28 = vld [vmem:[%s3135_s19 + $0x180] sm:$0xff]  ;;  %v484_v29 = vld [vmem:[%s3135_s19 + $0x1b8] sm:$0xff] }
  0xa4   : > { %v2660_v30 = vld [vmem:[#allocation5 + $0x290] ss:$8 sps:$4 sm:$0xff]  }
  0xa5   : > { %1145 = vmatpush2.bf16.msra.mxu0 %v2575_v38  ;;  %v502_v38 = vpack.c.bf16 %v467_v33, %v460_v32  ;;  %v512_v32 = vpack.c.bf16 %v484_v29, %v477_v28  ;;  %v2663_v33 = vld [vmem:[#allocation5 + $0x280] ss:$8 sps:$4 sm:$0xff]  }
  0xa6   : > { %1146 = vmatprep.subr.bf16.mxu0 %v2579_v39  ;;  %1218 = vmatpush2.bf16.msra.mxu1 %v2578_v40  ;;  %v2624_v39 = vld [vmem:[#allocation5 + $0x240] ss:$8 sps:$4 sm:$0xff]  }
  0xa7   : > { %1219 = vmatprep.subr.bf16.mxu1 %v2582_v41  ;;  %v457_v40 = vld [vmem:[%s3135_s19 + $0xe0] sm:$0xff]  ;;  %v464_v41 = vld [vmem:[%s3135_s19 + $0x118] sm:$0xff] }
  0xa8   : > { %v499_v47 = vpack.c.bf16 %v464_v41, %v457_v40  ;;  %v447_v40 = vld [vmem:[%s3135_s19 + $0x90] sm:$0xff]  ;;  %v454_v41 = vld [vmem:[%s3135_s19 + $0xc8] sm:$0xff] }
  0xa9   : > { %1147 = vmatpush2.bf16.msra.mxu0 %v2581_v42  ;;  %v2629_v42 = vld [vmem:[#allocation5 + $0x234] ss:$8 sps:$4 sm:$0xff]  }
  0xaa   : > { %1148 = vmatprep.subr.bf16.mxu0 %v2585_v43  ;;  %1220 = vmatpush2.bf16.msra.mxu1 %v2584_v44  ;;  %v472_v43 = vld [vmem:[%s3135_s19 + $0x158] sm:$0xff]  ;;  %v479_v44 = vld [vmem:[%s3135_s19 + $0x190] sm:$0xff] }
  0xab   : > { %1221 = vmatprep.subr.bf16.mxu1 %v2588_v45  ;;  %v459_v45 = vld [vmem:[%s3135_s19 + $0xf0] sm:$0xff] }
  0xac   : > { %v501_v53 = vpack.c.bf16 %v466_v46, %v459_v45  ;;  %v461_v46 = vld [vmem:[%s3135_s19 + $0x100] sm:$0xff] }
  0xad   : > { %1149 = vmatpush2.bf16.msra.mxu0 %v2587_v48  ;;  %v474_v48 = vld [vmem:[%s3135_s19 + $0x168] sm:$0xff] }
  0xae   : > { %1150 = vmatprep.subr.bf16.mxu0 %v2591_v50  ;;  %1222 = vmatpush2.bf16.msra.mxu1 %v2590_v51  ;;  %v2627_v50 = vld [vmem:[#allocation5 + $0x230] ss:$8 sps:$4 sm:$0xff]   ;;  %v507_v51 = vpack.c.bf16 %v479_v44, %v472_v43  ;;  %v509_v55 = vpack.c.bf16 %v481_v49, %v474_v48  ;;  %v469_v43 = vld [vmem:[%s3135_s19 + $0x140] sm:$0xff]  ;;  %v496_v44 = vpack.c.bf16 %v454_v41, %v447_v40  ;;  %v613_v40 = vlaneseq }
  0xaf   : > { %1223 = vmatprep.subr.bf16.mxu1 %v2594_v54  ;;  %v2630_v54 = vld [vmem:[#allocation5 + $0x220] ss:$8 sps:$4 sm:$0xff]   ;;  %v476_v48 = vld [vmem:[%s3135_s19 + $0x178] sm:$0xff]  ;;  %v483_v49 = vld [vmem:[%s3135_s19 + $0x1b0] sm:$0xff] }
  0xb1   : > { %1151 = vmatpush2.bf16.msra.mxu0 %v2593_v56  ;;  %v2635_v56 = vld [vmem:[#allocation5 + $0x214] ss:$8 sps:$4 sm:$0xff]  }
  0xb2   : > { %1152 = vmatprep.subr.bf16.mxu0 %v2597_v57  ;;  %1224 = vmatpush2.bf16.msra.mxu1 %v2596_v58  ;;  %v471_v57 = vld [vmem:[%s3135_s19 + $0x150] sm:$0xff]  ;;  %v478_v58 = vld [vmem:[%s3135_s19 + $0x188] sm:$0xff] }
  0xb3   : > { %1225 = vmatprep.subr.bf16.mxu1 %v2600_v59  ;;  %v473_v59 = vld [vmem:[%s3135_s19 + $0x160] sm:$0xff] }
  0xb5   : > { %1153 = vmatpush2.bf16.msra.mxu0 %v2599_v60  ;;  %v480_v60 = vld [vmem:[%s3135_s19 + $0x198] sm:$0xff] }
  0xb6   : > { %1154 = vmatprep.subr.bf16.mxu0 %v2603_v61  ;;  %1226 = vmatpush2.bf16.msra.mxu1 %v2602_v62  ;;  %v434_v61 = vld [vmem:[%s3135_s19 + $0x28] sm:$0xff]  ;;  %v441_v62 = vld [vmem:[%s3135_s19 + $0x60] sm:$0xff] }
  0xb7   : > { %1227 = vmatprep.subr.bf16.mxu1 %v2606_v63  ;;  %v2633_v63 = vld [vmem:[#allocation5 + $0x210] ss:$8 sps:$4 sm:$0xff]  }
  0xb9   : > { %1155 = vmatpush2.bf16.msra.mxu0 %v2605_v0  ;;  %v2638_v0 = vld [vmem:[#allocation5 + $0x204] ss:$8 sps:$4 sm:$0xff]  }
  0xba   : > { %1156 = vmatprep.subr.bf16.mxu0 %v2609_v1  ;;  %1228 = vmatpush2.bf16.msra.mxu1 %v2608_v2  ;;  %v506_v1 = vpack.c.bf16 %v478_v58, %v471_v57  ;;  %v490_v2 = vpack.c.bf16 %v441_v62, %v434_v61  ;;  %v2668_v57 = vld [vmem:[#allocation7 + $0x70] sm:$0xff]   ;;  %v2672_v61 = vld [vmem:[#allocation7 + $0x60] sm:$0xff]  }
  0xbb   : > { %1229 = vmatprep.subr.bf16.mxu1 %v2612_v4  ;;  %v2636_v4 = vld [vmem:[#allocation5 + $0x200] ss:$8 sps:$4 sm:$0xff]   ;;  %v2673_v62 = vld [vmem:[#allocation7 + $0x20] sm:$0xff]  }
  0xbc   : > { %v2669_v58 = vld [vmem:[#allocation7 + $0x30] sm:$0xff]  }
  0xbd   : > { %1157 = vmatpush2.bf16.msra.mxu0 %v2611_v3  ;;  %v508_v3 = vpack.c.bf16 %v480_v60, %v473_v59  ;;  %v2670_v59 = vld [vmem:[#allocation7 + $0x68] sm:$0xff]  }
  0xbe   : > { %1272 = vmatprep.subr.bf16.mxu0 %v2617_v8  ;;  %1230 = vmatpush2.bf16.msra.mxu1 %v2614_v6  ;;  %v435_v6 = vld [vmem:[%s3135_s19 + $0x30] sm:$0xff]  ;;  %v2671_v60 = vld [vmem:[#allocation7 + $0x28] sm:$0xff]  }
  0xbf   : > { %1359 = vmatprep.subr.bf16.mxu1 %v2644_v13  ;;  %v2639_v8 = vld [vmem:[#allocation5 + $0x2f0] ss:$8 sps:$4 sm:$0xff]   ;;  %v491_v11 = vpack.c.bf16 %v442_v7, %v435_v6  ;;  %v2650_v13 = vld [vmem:[#allocation5 + $0x2d4] ss:$8 sps:$4 sm:$0xff]   ;;  %v2682_v7 = vld [vmem:[#allocation8 + $0x38] sm:$0xff]  }
  0xc0   : > { %1159 = vmatmul.mubr.bf16.vlgmr.msra.gmra.mxu0 %v485_v14  ;;  %v449_v14 = vld [vmem:[%s3135_s19 + $0xa0] sm:$0xff]  ;;  %v2681_v6 = vld [vmem:[#allocation7] sm:$0xff]  }
  0xc1   : > { %1273 = vmatpush1.bf16.msra.mxu0 %v2615_v17  ;;  %1168 = vmatprep.mubr.bf16.mxu0 %v493_v18  ;;  %v2653_v17 = vld [vmem:[#allocation5 + $0x2c4] ss:$8 sps:$4 sm:$0xff]   ;;  %v498_v18 = vpack.c.bf16 %v456_v15, %v449_v14 }
  0xc2   : > { %1232 = vmatmul.mubr.bf16.vlgmr.msra.gmra.mxu1 %v487_v19  ;;  %1274 = vmatprep.subr.bf16.mxu0 %v2620_v20  ;;  %v2651_v19 = vld [vmem:[#allocation5 + $0x2c0] ss:$8 sps:$4 sm:$0xff]   ;;  %v2656_v20 = vld [vmem:[#allocation5 + $0x2b4] ss:$8 sps:$4 sm:$0xff]  }
  0xc3   : > { %1360 = vmatpush1.bf16.msra.mxu1 %v2642_v22  ;;  %1241 = vmatprep.mubr.bf16.mxu1 %v495_v23  ;;  %v470_v22 = vld [vmem:[%s3135_s19 + $0x148] sm:$0xff]  ;;  %v2654_v23 = vld [vmem:[#allocation5 + $0x2b0] ss:$8 sps:$4 sm:$0xff]  }
  0xc5   : > { %1275 = vmatpush1.bf16.msra.mxu0 %v2618_v21  ;;  %v463_v21 = vld [vmem:[%s3135_s19 + $0x110] sm:$0xff] }
  0xc6   : > { %1276 = vmatprep.subr.bf16.mxu0 %v2623_v24  ;;  %v2659_v24 = vld [vmem:[#allocation5 + $0x2a4] ss:$8 sps:$4 sm:$0xff]   ;;  %v505_v25 = vpack.c.bf16 %v470_v22, %v463_v21 }
  0xc8   : > { %1169 = vmatmul.mubr.bf16.gmra.mxu0 %v492_v31  ;;  %v2665_v31 = vld [vmem:[#allocation5 + $0x284] ss:$8 sps:$4 sm:$0xff]  }
  0xc9   : > { %1277 = vmatpush1.bf16.msra.mxu0 %v2621_v34  ;;  %1178 = vmatprep.mubr.bf16.mxu0 %v500_v35  ;;  %v433_v34 = vld [vmem:[%s3135_s19 + $0x20] sm:$0xff]  ;;  %v440_v35 = vld [vmem:[%s3135_s19 + $0x58] sm:$0xff] }
  0xca   : > { %1278 = vmatprep.subr.bf16.mxu0 %v2626_v36  ;;  %1242 = vmatmul.mubr.bf16.gmra.mxu1 %v494_v37  ;;  %v448_v36 = vld [vmem:[%s3135_s19 + $0x98] sm:$0xff]  ;;  %v455_v37 = vld [vmem:[%s3135_s19 + $0xd0] sm:$0xff] }
  0xcb   : > { %1251 = vmatprep.mubr.bf16.mxu1 %v502_v38  ;;  %v489_v38 = vpack.c.bf16 %v440_v35, %v433_v34 }
  0xcd   : > { %1279 = vmatpush1.bf16.msra.mxu0 %v2624_v39  ;;  %v497_v39 = vpack.c.bf16 %v455_v37, %v448_v36 }
  0xce   : > { %1280 = vmatprep.subr.bf16.mxu0 %v2629_v42  ;;  %v462_v42 = vld [vmem:[%s3135_s19 + $0x108] sm:$0xff] }
  0xcf   : > { %v504_v45 = vpack.c.bf16 %v469_v43, %v462_v42  ;;  %v614_v43 = vshrl.u32 %v613_v40, 7 }
  0xd0   : > { %1179 = vmatmul.mubr.bf16.gmra.mxu0 %v499_v47  ;;  %v468_v47 = vld [vmem:[%s3135_s19 + $0x138] sm:$0xff] }
  0xd1   : > { %1281 = vmatpush1.bf16.msra.mxu0 %v2627_v50  ;;  %1188 = vmatprep.mubr.bf16.mxu0 %v507_v51  ;;  %v503_v50 = vpack.c.bf16 %v468_v47, %v461_v46  ;;  %v511_v51 = vpack.c.bf16 %v483_v49, %v476_v48  ;;  %v619_v46 = vsub.s32 1, %v614_v43  ;;  %v611_v47 = vld [vmem:[%s3375_s2] sm:$0x3]  ;;  %v615_v48 = vsub.s32 0, %v614_v43 }
  0xd2   : > { %1282 = vmatprep.subr.bf16.mxu0 %v2632_v52  ;;  %1252 = vmatmul.mubr.bf16.gmra.mxu1 %v501_v53  ;;  %v475_v52 = vld [vmem:[%s3135_s19 + $0x170] sm:$0xff]  ;;  %v482_v53 = vld [vmem:[%s3135_s19 + $0x1a8] sm:$0xff] }
  0xd3   : > { %1261 = vmatprep.mubr.bf16.mxu1 %v509_v55  ;;  %v2666_v55 = vld [vmem:[#allocation7 + $0x78] sm:$0xff]  }
  0xd4   : > { %2315 = vmatprep.subr.bf16.mxu1 %v2666_v55 }
  0xd5   : > { %1283 = vmatpush1.bf16.msra.mxu0 %v2630_v54  ;;  %v510_v54 = vpack.c.bf16 %v482_v53, %v475_v52  ;;  %v3250_v52 = vrot.slane %v611_v47, %v615_v48 }
  0xd6   : > { %1284 = vmatprep.subr.bf16.mxu0 %v2635_v56  ;;  %v2667_v56 = vld [vmem:[#allocation7 + $0x38] sm:$0xff]  }
  0xd8   : > { %1189 = vmatmul.mubr.bf16.gmra.mxu0 %v506_v1  ;;  %v2676_v1 = vld [vmem:[#allocation7 + $0x50] sm:$0xff]  }
  0xd9   : > { %1285 = vmatpush1.bf16.msra.mxu0 %v2633_v63  ;;  %1304 = vmatprep.mubr.bf16.mxu0 %v490_v2  ;;  %v2674_v63 = vld [vmem:[#allocation7 + $0x58] sm:$0xff]   ;;  %v2677_v2 = vld [vmem:[#allocation7 + $0x10] sm:$0xff]  }
  0xda   : > { %1286 = vmatprep.subr.bf16.mxu0 %v2638_v0  ;;  %1262 = vmatmul.mubr.bf16.gmra.mxu1 %v508_v3  ;;  %v2675_v0 = vld [vmem:[#allocation7 + $0x18] sm:$0xff]   ;;  %v2678_v3 = vld [vmem:[#allocation7 + $0x48] sm:$0xff]  }
  0xdb   : > { %1377 = vmatprep.mubr.bf16.mxu1 %v2913_v9 }
  0xdd   : > { %1287 = vmatpush1.bf16.msra.mxu0 %v2636_v4  ;;  %v2679_v4 = vld [vmem:[#allocation7 + $0x8] sm:$0xff]  }
  0xde   : > { %1288 = vmatprep.subr.bf16.mxu0 %v2641_v5  ;;  %v2680_v5 = vld [vmem:[#allocation7 + $0x40] sm:$0xff]  }
  0xe1   : > { %1289 = vmatpush2.bf16.msra.mxu0 %v2639_v8  ;;  %v2683_v8 = vld [vmem:[#allocation8 + $0x30] sm:$0xff]  }
  0xe2   : > { %1290 = vmatprep.subr.bf16.mxu0 %v2647_v10  ;;  %2227 = vmatmul.mubr.msk.bf16.vlgmr.msra.gmra.mxu1 %vm1113_vm0, %v491_v11 }
  0xe3   : > { %1387 = vmatprep.mubr.bf16.mxu1 %v2913_v9  ;;  %2316 = vmatpush3.bf16.msra.mxu1 %v2667_v56 }
  0xe4   : > { %2317 = vmatprep.subr.bf16.mxu1 %v2668_v57 }
  0xe5   : > { %1291 = vmatpush2.bf16.msra.mxu0 %v2645_v12 }
  0xe6   : > { %1292 = vmatprep.subr.bf16.mxu0 %v2650_v13 }
  0xe7   : > { %2318 = vmatpush3.bf16.msra.mxu1 %v2669_v58 }
  0xe8   : > { %2319 = vmatprep.subr.bf16.mxu1 %v2670_v59 }
  0xe9   : > { %1293 = vmatpush2.bf16.msra.mxu0 %v2648_v16 }
  0xea   : > { %1294 = vmatprep.subr.bf16.mxu0 %v2653_v17  ;;  %2228 = vmatmul.mubr.msk.bf16.gmra.mxu1 %vm1113_vm0, %v498_v18 }
  0xeb   : > { %1397 = vmatprep.mubr.bf16.mxu1 %v2913_v9  ;;  %2320 = vmatpush3.bf16.msra.mxu1 %v2671_v60 }
  0xec   : > { %2321 = vmatprep.subr.bf16.mxu1 %v2672_v61 }
  0xed   : > { %1295 = vmatpush2.bf16.msra.mxu0 %v2651_v19 }
  0xee   : > { %1296 = vmatprep.subr.bf16.mxu0 %v2656_v20 }
  0xef   : > { %2322 = vmatpush3.bf16.msra.mxu1 %v2673_v62 }
  0xf0   : > { %2323 = vmatprep.subr.bf16.mxu1 %v2674_v63 }
  0xf1   : > { %1297 = vmatpush2.bf16.msra.mxu0 %v2654_v23 }
  0xf2   : > { %1298 = vmatprep.subr.bf16.mxu0 %v2659_v24  ;;  %2229 = vmatmul.mubr.msk.bf16.gmra.mxu1 %vm1113_vm0, %v505_v25 }
  0xf3   : > { %1407 = vmatprep.mubr.bf16.mxu1 %v2913_v9  ;;  %2324 = vmatpush3.bf16.msra.mxu1 %v2675_v0  ;;  %v2684_v9 = vld [vmem:[#allocation8 + $0x28] sm:$0xff]  }
  0xf4   : > { %2325 = vmatprep.subr.bf16.mxu1 %v2676_v1 }
  0xf5   : > { %1299 = vmatpush2.bf16.msra.mxu0 %v2657_v26 }
  0xf6   : > { %1300 = vmatprep.subr.bf16.mxu0 %v2662_v27 }
  0xf7   : > { %2326 = vmatpush3.bf16.msra.mxu1 %v2677_v2 }
  0xf8   : > { %2327 = vmatprep.subr.bf16.mxu1 %v2678_v3 }
  0xf9   : > { %1301 = vmatpush2.bf16.msra.mxu0 %v2660_v30 }
  0xfa   : > { %1302 = vmatprep.subr.bf16.mxu0 %v2665_v31  ;;  %2230 = vmatmul.mubr.msk.bf16.gmra.mxu1 %vm1113_vm0, %v512_v32 }
  0xfb   : > { %2328 = vmatpush3.bf16.msra.mxu1 %v2679_v4 }
  0xfc   : > { %2329 = vmatprep.subr.bf16.mxu1 %v2680_v5 }
  0xfd   : > { %1303 = vmatpush2.bf16.msra.mxu0 %v2663_v33 }
  0xfe   : > { %2379 = vmatprep.subr.bf16.mxu0 %v2682_v7 }
  0xff   : > { %2330 = vmatpush3.bf16.msra.mxu1 %v2681_v6 }
 0x100   : > { %1305 = vmatmul.mubr.bf16.vlgmr.msra.gmra.mxu0 %v489_v38 }
 0x101   : > { %1314 = vmatprep.mubr.bf16.mxu0 %v497_v39  ;;  %2380 = vmatpush3.bf16.msra.mxu0 %v2682_v7 }
 0x102   : > { %2381 = vmatprep.subr.bf16.mxu0 %v2683_v8 }
 0x105   : > { %2382 = vmatpush3.bf16.msra.mxu0 %v2683_v8 }
 0x106   : > { %2383 = vmatprep.subr.bf16.mxu0 %v2684_v9 }
 0x108   : > { %1315 = vmatmul.mubr.bf16.gmra.mxu0 %v496_v44 }
 0x109   : > { %1324 = vmatprep.mubr.bf16.mxu0 %v504_v45  ;;  %2384 = vmatpush3.bf16.msra.mxu0 %v2684_v9 }
 0x110   : > { %1325 = vmatmul.mubr.bf16.gmra.mxu0 %v503_v50 }
 0x111   : > { %1334 = vmatprep.mubr.bf16.mxu0 %v511_v51  ;;  %v3248_v51 = vrot.slane %v611_v47, %v619_v46 }
 0x118   : > { %1335 = vmatmul.mubr.bf16.gmra.mxu0 %v510_v54 }
 0x180   : > { %v1160_v11 = vpop.f32.mrf.mxu0 }
 0x181   : > { %v1161_v56 = vadd.f32 %v1160_v11, %v3250_v52 }
 0x182   : > { %v1233_v10 = vpop.f32.mrf.mxu1  ;;  %v1162_v14 = vpop.f32.mrf.mxu0 }
 0x183   : > { %v1163_v55 = vadd.f32 %v1162_v14, %v3248_v51  ;;  %v1234_v63 = vadd.f32 %v1233_v10, %v1161_v56 }
 0x184   : > { %v1235_v12 = vpop.f32.mrf.mxu1  ;;  %v1164_v17 = vpop.f32.mrf.mxu0 }
 0x185   : > { %v1165_v58 = vadd.f32 %v1164_v17, %v3250_v52  ;;  %v1236_v61 = vadd.f32 %v1235_v12, %v1163_v55 }
 0x186   : > { %v1237_v13 = vpop.f32.mrf.mxu1  ;;  %v1166_v20 = vpop.f32.mrf.mxu0 }
 0x187   : > { %v1167_v62 = vadd.f32 %v1166_v20, %v3248_v51  ;;  %v1238_v1 = vadd.f32 %v1237_v13, %v1165_v58 }
 0x188   : > { %v1239_v15 = vpop.f32.mrf.mxu1  ;;  %v1170_v22 = vpop.f32.mrf.mxu0 }
 0x189   : > { %v1240_v6 = vadd.f32 %v1239_v15, %v1167_v62  ;;  %v1171_v9 = vadd.f32 %v1170_v22, %v3250_v52 }
 0x18a   : > { %v3209_v16 = vpop.f32.mrf.mxu1  ;;  %v1172_v25 = vpop.f32.mrf.mxu0 }
 0x18b   : > { %v1173_v7 = vadd.f32 %v1172_v25, %v3248_v51  ;;  %v1244_v15 = vadd.f32 %v3209_v16, %v1171_v9 }
 0x18c   : > { %v3211_v18 = vpop.f32.mrf.mxu1  ;;  %v1174_v28 = vpop.f32.mrf.mxu0 }
 0x18d   : > { %v1175_v14 = vadd.f32 %v1174_v28, %v3250_v52  ;;  %v1246_v43 = vadd.f32 %v3211_v18, %v1173_v7 }
 0x18e   : > { %v3213_v19 = vpop.f32.mrf.mxu1  ;;  %v1176_v31 = vpop.f32.mrf.mxu0 }
 0x18f   : > { %v1177_v46 = vadd.f32 %v1176_v31, %v3248_v51  ;;  %v1248_v22 = vadd.f32 %v3213_v19, %v1175_v14 }
 0x190   : > { %v3215_v21 = vpop.f32.mrf.mxu1  ;;  %v3233_v34 = vpop.f32.mrf.mxu0 }
 0x191   : > { %v1181_v16 = vadd.f32 %v3233_v34, %v3250_v52 }
 0x192   : > { %v3217_v23 = vpop.f32.mrf.mxu1  ;;  %v1182_v36 = vpop.f32.mrf.mxu0 }
 0x193   : > { %v1183_v18 = vadd.f32 %v1182_v36, %v3248_v51 }
 0x194   : > { %v3219_v24 = vpop.f32.mrf.mxu1  ;;  %v3235_v38 = vpop.f32.mrf.mxu0 }
 0x195   : > { %v1185_v19 = vadd.f32 %v3235_v38, %v3250_v52  ;;  %v1256_v36 = vadd.f32 %v3219_v24, %v1183_v18 }
 0x196   : > { %v3221_v26 = vpop.f32.mrf.mxu1  ;;  %v3237_v41 = vpop.f32.mrf.mxu0 }
 0x197   : > { %v1258_v38 = vadd.f32 %v3221_v26, %v1185_v19 }
 0x198   : > { %v3223_v27 = vpop.f32.mrf.mxu1  ;;  %v3239_v44 = vpop.f32.mrf.mxu0 }
 0x19a   : > { %v3225_v29 = vpop.f32.mrf.mxu1  ;;  %v3246_v49 = vpop.f32.mrf.mxu0 }
 0x19b   : > { %v1193_v24 = vadd.f32 %v3246_v49, %v3248_v51 }
 0x19c   : > { %v3227_v30 = vpop.f32.mrf.mxu1  ;;  %v3252_v53 = vpop.f32.mrf.mxu0 }
 0x19d   : > { %v1195_v26 = vadd.f32 %v3252_v53, %v3250_v52  ;;  %v1266_v49 = vadd.f32 %v3227_v30, %v1193_v24 }
 0x19e   : > { %v3229_v32 = vpop.f32.mrf.mxu1  ;;  %v3256_v57 = vpop.f32.mrf.mxu0 }
 0x1a0   : > { %v3231_v33 = vpop.f32.mrf.mxu1 }
 0x1a2   : > { %v1379_v35 = vpop.f32.mrf.mxu1 }
 0x1a4   : > { %v1381_v37 = vpop.f32.mrf.mxu1 }
 0x1a6   : > { %v1383_v39 = vpop.f32.mrf.mxu1 }
 0x1a8   : > { %v1385_v42 = vpop.f32.mrf.mxu1 }
 0x1aa   : > { %v3241_v45 = vpop.f32.mrf.mxu1 }
 0x1ac   : > { %v1391_v50 = vpop.f32.mrf.mxu1 }
 0x1ae   : > { %v1393_v54 = vpop.f32.mrf.mxu1 }
 0x1b0   : > { %v1395_v60 = vpop.f32.mrf.mxu1 }
 0x1b2   : > { %v3260_v5 = vpop.f32.mrf.mxu1 }
 0x1b4   : > { %v1401_v13 = vpop.f32.mrf.mxu1 }
 0x1c0   : > { %v1306_v59 = vpop.f32.mrf.mxu0 }
 0x1c1   : > { %v1307_v3 = vadd.f32 %v1306_v59, %v1234_v63  ;;  %v1250_v59 = vadd.f32 %v3215_v21, %v1177_v46 }
 0x1c2   : > { %v1308_v0 = vpop.f32.mrf.mxu0 }
 0x1c3   : > { %v1309_v2 = vadd.f32 %v1308_v0, %v1236_v61  ;;  %v1380_v10 = vadd.f32 %v1379_v35, %v1307_v3  ;;  %v1403_v35 = vpop.f32.mrf.mxu1 }
 0x1c4   : > { %v1310_v4 = vpop.f32.mrf.mxu0 }
 0x1c5   : > { %v1311_v8 = vadd.f32 %v1310_v4, %v1238_v1  ;;  %v1382_v12 = vadd.f32 %v1381_v37, %v1309_v2  ;;  %v1418_v37 = vmax.f32 %v1380_v10, 0.0  ;;  %v1405_v21 = vpop.f32.mrf.mxu1  ;;  %v1187_v4 = vadd.f32 %v3237_v41, %v3248_v51 }
 0x1c6   : > { %v1312_v11 = vpop.f32.mrf.mxu0 }
 0x1c7   : > { %v1384_v17 = vadd.f32 %v1383_v39, %v1311_v8  ;;  %v1313_v20 = vadd.f32 %v1312_v11, %v1240_v6  ;;  %v1419_v55 = vmax.f32 %v1382_v12, 0.0  ;;  %v1254_v6 = vadd.f32 %v3217_v23, %v1181_v16  ;;  %v1409_v12 = vpop.f32.mrf.mxu1 }
 0x1c8   : > { %v1316_v40 = vpop.f32.mrf.mxu0  ;;  %v1191_v23 = vadd.f32 %v3239_v44, %v3250_v52  ;;  %v1268_v52 = vadd.f32 %v3229_v32, %v1195_v26 }
 0x1c9   : > { %v1386_v47 = vadd.f32 %v1385_v42, %v1313_v20  ;;  %v1420_v25 = vmax.f32 %v1384_v17, 0.0  ;;  %v1317_v39 = vadd.f32 %v1316_v40, %v1244_v15  ;;  %v1260_v17 = vadd.f32 %v3223_v27, %v1187_v4  ;;  %v1411_v27 = vpop.f32.mrf.mxu1  ;;  %v2691_v4 = vld [vmem:[#allocation10 + $0x30] sm:$0xff]  }
 0x1ca   : > { %v1318_v48 = vpop.f32.mrf.mxu0 }
 0x1cb   : > { %v1421_v56 = vmax.f32 %v1386_v47, 0.0  ;;  %v1319_v28 = vadd.f32 %v1318_v48, %v1246_v43  ;;  %v1434_v42 = vpack.c.bf16 %v1420_v25, %v1418_v37  ;;  %v1390_v2 = vadd.f32 %v3241_v45, %v1317_v39  ;;  %v1413_v37 = vpop.f32.mrf.mxu1 }
 0x1cc   : > { %v1320_v58 = vpop.f32.mrf.mxu0  ;;  %v1197_v25 = vadd.f32 %v3256_v57, %v3248_v51  ;;  %v1264_v48 = vadd.f32 %v3225_v29, %v1191_v23 }
 0x1cd   : > { %v1321_v61 = vadd.f32 %v1320_v58, %v1248_v22  ;;  %v1435_v31 = vpack.c.bf16 %v1421_v56, %v1419_v55  ;;  %v1392_v63 = vadd.f32 %v1391_v50, %v1319_v28  ;;  %v1422_v11 = vmax.f32 %v1390_v2, 0.0  ;;  %v2687_v2 = vld [vmem:[#allocation8 + $0x10] sm:$0xff]  }
 0x1ce   : > { %v1322_v62 = vpop.f32.mrf.mxu0  ;;  %v1270_v58 = vadd.f32 %v3231_v33, %v1197_v25  ;;  %v2685_v33 = vld [vmem:[#allocation8 + $0x20] sm:$0xff]  }
 0x1cf   : > { %v1394_v0 = vadd.f32 %v1393_v54, %v1321_v61  ;;  %v1323_v1 = vadd.f32 %v1322_v62, %v1250_v59  ;;  %1609 = vmatprep.mubr.bf16.mxu1 %v1435_v31  ;;  %v1423_v50 = vmax.f32 %v1392_v63, 0.0  ;;  %v1415_v31 = vpop.f32.mrf.mxu1  ;;  %2385 = vmatprep.subr.bf16.mxu0 %v2685_v33 }
 0x1d0   : > { %v1326_v3 = vpop.f32.mrf.mxu0  ;;  %1610 = vmatmul.mubr.bf16.vlgmr.msra.gmra.mxu1 %v1434_v42  ;;  %2386 = vmatpush3.bf16.msra.mxu0 %v2685_v33 }
 0x1d1   : > { %v1396_v34 = vadd.f32 %v1395_v60, %v1323_v1  ;;  %v1424_v7 = vmax.f32 %v1394_v0, 0.0  ;;  %v1327_v45 = vadd.f32 %v1326_v3, %v1254_v6  ;;  %v2686_v1 = vld [vmem:[#allocation8 + $0x18] sm:$0xff]   ;;  %v2688_v3 = vld [vmem:[#allocation8 + $0x8] sm:$0xff]   ;;  %v2693_v6 = vld [vmem:[#allocation10 + $0x20] sm:$0xff]  }
 0x1d2   : > { %v1328_v8 = vpop.f32.mrf.mxu0  ;;  %2387 = vmatprep.subr.bf16.mxu0 %v2686_v1 }
 0x1d3   : > { %v1425_v54 = vmax.f32 %v1396_v34, 0.0  ;;  %v1329_v9 = vadd.f32 %v1328_v8, %v1256_v36  ;;  %v1436_v10 = vpack.c.bf16 %v1424_v7, %v1422_v11  ;;  %v1400_v47 = vadd.f32 %v3260_v5, %v1327_v45  ;;  %v2690_v36 = vld [vmem:[#allocation10 + $0x38] sm:$0xff]   ;;  %v2692_v34 = vld [vmem:[#allocation10 + $0x28] sm:$0xff]  }
 0x1d4   : > { %v1330_v14 = vpop.f32.mrf.mxu0  ;;  %2388 = vmatpush3.bf16.msra.mxu0 %v2686_v1  ;;  %2403 = vmatprep.subr.bf16.mxu1 %v2690_v36  ;;  %v2694_v7 = vld [vmem:[#allocation10 + $0x18] sm:$0xff]  }
 0x1d5   : > { %v1331_v41 = vadd.f32 %v1330_v14, %v1258_v38  ;;  %v1437_v60 = vpack.c.bf16 %v1425_v54, %v1423_v50  ;;  %v1402_v40 = vadd.f32 %v1401_v13, %v1329_v9  ;;  %v1426_v28 = vmax.f32 %v1400_v47, 0.0  ;;  %2389 = vmatprep.subr.bf16.mxu0 %v2687_v2  ;;  %2404 = vmatpush3.bf16.msra.mxu1 %v2690_v36  ;;  %v2231_v54 = vld [vmem:[%s3377_s4] ss:$0 sm:$0xff] }
 0x1d6   : > { %v1332_v20 = vpop.f32.mrf.mxu0  ;;  %2405 = vmatprep.subr.bf16.mxu1 %v2691_v4 }
 0x1d7   : > { %v1404_v43 = vadd.f32 %v1403_v35, %v1331_v41  ;;  %v1333_v46 = vadd.f32 %v1332_v20, %v1260_v17  ;;  %1617 = vmatprep.mubr.bf16.mxu1 %v1437_v60  ;;  %v1427_v53 = vmax.f32 %v1402_v40, 0.0 }
 0x1d8   : > { %v1336_v15 = vpop.f32.mrf.mxu0  ;;  %1618 = vmatmul.mubr.bf16.gmra.mxu1 %v1436_v10  ;;  %2390 = vmatpush3.bf16.msra.mxu0 %v2687_v2 }
 0x1d9   : > { %v1406_v44 = vadd.f32 %v1405_v21, %v1333_v46  ;;  %v1428_v22 = vmax.f32 %v1404_v43, 0.0  ;;  %v1337_v5 = vadd.f32 %v1336_v15, %v1264_v48  ;;  %2391 = vmatprep.subr.bf16.mxu0 %v2688_v3  ;;  %v2689_v21 = vld [vmem:[#allocation8] sm:$0xff]   ;;  %2406 = vmatpush3.bf16.msra.mxu1 %v2691_v4 }
 0x1da   : > { %v1338_v55 = vpop.f32.mrf.mxu0  ;;  %2407 = vmatprep.subr.bf16.mxu1 %v2692_v34 }
 0x1db   : > { %v1429_v13 = vmax.f32 %v1406_v44, 0.0  ;;  %v1339_v56 = vadd.f32 %v1338_v55, %v1266_v49  ;;  %v1438_v51 = vpack.c.bf16 %v1428_v22, %v1426_v28  ;;  %v1410_v61 = vadd.f32 %v1409_v12, %v1337_v5 }
 0x1dc   : > { %v1340_v39 = vpop.f32.mrf.mxu0  ;;  %2392 = vmatpush3.bf16.msra.mxu0 %v2688_v3 }
 0x1dd   : > { %v1341_v30 = vadd.f32 %v1340_v39, %v1268_v52  ;;  %v1439_v35 = vpack.c.bf16 %v1429_v13, %v1427_v53  ;;  %v1412_v57 = vadd.f32 %v1411_v27, %v1339_v56  ;;  %v1430_v19 = vmax.f32 %v1410_v61, 0.0  ;;  %2393 = vmatprep.subr.bf16.mxu0 %v2689_v21  ;;  %2408 = vmatpush3.bf16.msra.mxu1 %v2692_v34  ;;  %v2695_v61 = vld [vmem:[#allocation10 + $0x10] sm:$0xff]  }
 0x1de   : > { %v1342_v59 = vpop.f32.mrf.mxu0  ;;  %2409 = vmatprep.subr.bf16.mxu1 %v2693_v6 }
 0x1df   : > { %v1414_v18 = vadd.f32 %v1413_v37, %v1341_v30  ;;  %v1343_v29 = vadd.f32 %v1342_v59, %v1270_v58  ;;  %1625 = vmatprep.mubr.bf16.mxu1 %v1439_v35  ;;  %v1431_v42 = vmax.f32 %v1412_v57, 0.0 }
 0x1e0   : > { %1626 = vmatmul.mubr.bf16.gmra.mxu1 %v1438_v51  ;;  %2394 = vmatpush3.bf16.msra.mxu0 %v2689_v21 }
 0x1e1   : > { %v1416_v32 = vadd.f32 %v1415_v31, %v1343_v29  ;;  %v1432_v16 = vmax.f32 %v1414_v18, 0.0  ;;  %2410 = vmatpush3.bf16.msra.mxu1 %v2693_v6  ;;  %v2696_v31 = vld [vmem:[#allocation10 + $0x8] sm:$0xff]  }
 0x1e2   : > { %2411 = vmatprep.subr.bf16.mxu1 %v2694_v7 }
 0x1e3   : > { %v1433_v62 = vmax.f32 %v1416_v32, 0.0  ;;  %v1440_v0 = vpack.c.bf16 %v1432_v16, %v1430_v19  ;;  %v2697_v32 = vld [vmem:[#allocation10] sm:$0xff]  }
 0x1e5   : > { %v1441_v63 = vpack.c.bf16 %v1433_v62, %v1431_v42  ;;  %2412 = vmatpush3.bf16.msra.mxu1 %v2694_v7  ;;  %v2248_v62 = vld [vmem:[%s3379_s6] ss:$0 sm:$0xff] }
 0x1e6   : > { %2413 = vmatprep.subr.bf16.mxu1 %v2695_v61 }
 0x1e7   : > { %1633 = vmatprep.mubr.bf16.mxu1 %v1441_v63 }
 0x1e8   : > { %1634 = vmatmul.mubr.bf16.gmra.mxu1 %v1440_v0 }
 0x1e9   : > { %2414 = vmatpush3.bf16.msra.mxu1 %v2695_v61 }
 0x1ea   : > { %2415 = vmatprep.subr.bf16.mxu1 %v2696_v31 }
 0x1ed   : > { %2416 = vmatpush3.bf16.msra.mxu1 %v2696_v31 }
 0x1ee   : > { %2417 = vmatprep.subr.bf16.mxu1 %v2697_v32 }
 0x1f1   : > { %2418 = vmatpush3.bf16.msra.mxu1 %v2697_v32 }
 0x290   : > { %v2331_v8 = vpop.f32.mrf.mxu1 }
 0x292   : > { %v2332_v38 = vpop.f32.mrf.mxu1 }
 0x293   : > { %v2333_v50 = vadd.f32 %v2332_v38, %v2331_v8 }
 0x294   : > { %v2334_v9 = vpop.f32.mrf.mxu1 }
 0x295   : > { %v1612_v45 = vadd.f32 %v2333_v50, %v2231_v54 }
 0x296   : > { %v2335_v11 = vpop.f32.mrf.mxu1 }
 0x297   : > { %v2336_v14 = vadd.f32 %v2335_v11, %v2334_v9  ;;  %v1642_v41 = vmax.f32 %v1612_v45, 0.0 }
 0x298   : > { %v2337_v12 = vpop.f32.mrf.mxu1 }
 0x299   : > { %v1615_v17 = vadd.f32 %v2336_v14, %v2231_v54 }
 0x29a   : > { %v2338_v24 = vpop.f32.mrf.mxu1 }
 0x29b   : > { %v1643_v60 = vmax.f32 %v1615_v17, 0.0  ;;  %v2339_v23 = vadd.f32 %v2338_v24, %v2337_v12 }
 0x29c   : > { %v2340_v20 = vpop.f32.mrf.mxu1 }
 0x29d   : > { %v1650_v10 = vpack.c.bf16 %v1643_v60, %v1642_v41  ;;  %v1620_v40 = vadd.f32 %v2339_v23, %v2231_v54 }
 0x29e   : > { %v2341_v26 = vpop.f32.mrf.mxu1 }
 0x29f   : > { %v2342_v43 = vadd.f32 %v2341_v26, %v2340_v20  ;;  %2395 = vmatprep.mubr.bf16.mxu0 %v1650_v10  ;;  %v1644_v15 = vmax.f32 %v1620_v40, 0.0  ;;  %v2257_v20 = vld [vmem:[%s3381_s8] ss:$0 sm:$0xff] }
 0x2a0   : > { %v2343_v46 = vpop.f32.mrf.mxu1 }
 0x2a1   : > { %v1623_v47 = vadd.f32 %v2342_v43, %v2231_v54 }
 0x2a2   : > { %v2344_v27 = vpop.f32.mrf.mxu1 }
 0x2a3   : > { %v1645_v49 = vmax.f32 %v1623_v47, 0.0  ;;  %v2345_v25 = vadd.f32 %v2344_v27, %v2343_v46 }
 0x2a4   : > { %v2346_v44 = vpop.f32.mrf.mxu1 }
 0x2a5   : > { %v1651_v48 = vpack.c.bf16 %v1645_v49, %v1644_v15  ;;  %v1628_v55 = vadd.f32 %v2345_v25, %v2231_v54 }
 0x2a6   : > { %v2347_v22 = vpop.f32.mrf.mxu1 }
 0x2a7   : > { %v2348_v52 = vadd.f32 %v2347_v22, %v2346_v44  ;;  %2396 = vmatmul.mubr.bf16.vlgmr.msra.gmra.mxu0 %v1651_v48  ;;  %v1646_v28 = vmax.f32 %v1628_v55, 0.0 }
 0x2a8   : > { %v2349_v53 = vpop.f32.mrf.mxu1 }
 0x2a9   : > { %v1631_v13 = vadd.f32 %v2348_v52, %v2231_v54 }
 0x2aa   : > { %v2350_v56 = vpop.f32.mrf.mxu1 }
 0x2ab   : > { %v1647_v5 = vmax.f32 %v1631_v13, 0.0  ;;  %v2351_v37 = vadd.f32 %v2350_v56, %v2349_v53 }
 0x2ac   : > { %v2352_v39 = vpop.f32.mrf.mxu1 }
 0x2ad   : > { %v1652_v58 = vpack.c.bf16 %v1647_v5, %v1646_v28  ;;  %v1636_v35 = vadd.f32 %v2351_v37, %v2231_v54 }
 0x2ae   : > { %v2353_v30 = vpop.f32.mrf.mxu1 }
 0x2af   : > { %v2354_v59 = vadd.f32 %v2353_v30, %v2352_v39  ;;  %2399 = vmatprep.mubr.bf16.mxu0 %v1652_v58  ;;  %v1648_v57 = vmax.f32 %v1636_v35, 0.0 }
 0x2b1   : > { %v1639_v51 = vadd.f32 %v2354_v59, %v2231_v54 }
 0x2b3   : > { %v1649_v18 = vmax.f32 %v1639_v51, 0.0 }
 0x2b5   : > { %v1653_v29 = vpack.c.bf16 %v1649_v18, %v1648_v57 }
 0x2b7   : > { %2400 = vmatmul.mubr.bf16.gmra.mxu0 %v1653_v29 }
 0x367   : > { %v2397_v16 = vpop.f32.mrf.mxu0 }
 0x368   : > { %v1768_v33 = vadd.f32 %v2397_v16, %v2248_v62 }
 0x369   : > { %v1759_v42 = vpop.f32.mrf.mxu0 }
 0x36a   : > { %v1760_v63 = vadd.f32 %v2248_v62, %v1759_v42  ;;  %v1792_v4 = vmax.f32 %v1768_v33, 0.0 }
 0x36b   : > { %v2398_v19 = vpop.f32.mrf.mxu0 }
 0x36c   : > { %v1771_v0 = vadd.f32 %v2398_v19, %v2248_v62  ;;  %v1790_v21 = vmax.f32 %v1760_v63, 0.0 }
 0x36d   : > { %v1762_v1 = vpop.f32.mrf.mxu0 }
 0x36e   : > { %v1763_v2 = vadd.f32 %v2248_v62, %v1762_v1  ;;  %v1793_v3 = vmax.f32 %v1771_v0, 0.0 }
 0x370   : > { %v1791_v36 = vmax.f32 %v1763_v2, 0.0  ;;  %v1799_v6 = vpack.c.bf16 %v1793_v3, %v1792_v4 }
 0x372   : > { %v1798_v34 = vpack.c.bf16 %v1791_v36, %v1790_v21 }
 0x374   : > { %2419 = vmatprep.mubr.bf16.mxu1 %v1798_v34 }
 0x375   : > { %2420 = vmatmul.mubr.bf16.vlgmr.msra.gmra.mxu1 %v1799_v6 }
 0x377   : > { %v2401_v7 = vpop.f32.mrf.mxu0 }
 0x378   : > { %v1784_v9 = vadd.f32 %v2401_v7, %v2248_v62 }
 0x379   : > { %v1775_v8 = vpop.f32.mrf.mxu0 }
 0x37a   : > { %v1776_v50 = vadd.f32 %v2248_v62, %v1775_v8  ;;  %v1796_v24 = vmax.f32 %v1784_v9, 0.0 }
 0x37b   : > { %v2402_v38 = vpop.f32.mrf.mxu0 }
 0x37c   : > { %v1787_v54 = vadd.f32 %v2402_v38, %v2248_v62  ;;  %v1794_v12 = vmax.f32 %v1776_v50, 0.0 }
 0x37d   : > { %v1778_v11 = vpop.f32.mrf.mxu0 }
 0x37e   : > { %v1779_v45 = vadd.f32 %v2248_v62, %v1778_v11  ;;  %v1797_v14 = vmax.f32 %v1787_v54, 0.0 }
 0x380   : > { %v1795_v17 = vmax.f32 %v1779_v45, 0.0  ;;  %v1801_v60 = vpack.c.bf16 %v1797_v14, %v1796_v24 }
 0x382   : > { %v1800_v41 = vpack.c.bf16 %v1795_v17, %v1794_v12 }
 0x384   : > { %2423 = vmatprep.mubr.bf16.mxu1 %v1800_v41 }
 0x385   : > { %2424 = vmatmul.mubr.bf16.gmra.mxu1 %v1801_v60 }
 0x435   : > { %v2421_v23 = vpop.f32.mrf.mxu1 }
 0x436   : > { %v1916_v40 = vadd.f32 %v2421_v23, %v2257_v20 }
 0x437   : > { %v1907_v10 = vpop.f32.mrf.mxu1 }
 0x438   : > { %v1908_v47 = vadd.f32 %v2257_v20, %v1907_v10 }
 0x439   : > { %v2422_v26 = vpop.f32.mrf.mxu1 }
 0x43a   : > { %v1919_v43 = vadd.f32 %v2422_v26, %v2257_v20 }
 0x43b   : > { %v1910_v46 = vpop.f32.mrf.mxu1 }
 0x43c   : > { %v2300_v27 = vpack.c.bf16 %v1919_v43, %v1916_v40  ;;  %v1911_v15 = vadd.f32 %v2257_v20, %v1910_v46 }
 0x43e   : > { %2312 = vst [vmem:[%s3305_s3 + $0x8] sm:$0xff] %v2300_v27   ;;  %v2295_v49 = vpack.c.bf16 %v1911_v15, %v1908_v47 }
 0x440   : > { %2296 = vst [vmem:[%s3305_s3] sm:$0xff] %v2295_v49  }
 0x445   : > { %v2425_v25 = vpop.f32.mrf.mxu1 }
 0x446   : > { %v1932_v22 = vadd.f32 %v2425_v25, %v2257_v20 }
 0x447   : > { %v1923_v44 = vpop.f32.mrf.mxu1 }
 0x448   : > { %v1924_v53 = vadd.f32 %v2257_v20, %v1923_v44 }
 0x449   : > { %v2426_v48 = vpop.f32.mrf.mxu1 }
 0x44a   : > { %v1935_v55 = vadd.f32 %v2426_v48, %v2257_v20 }
 0x44b   : > { %v1926_v52 = vpop.f32.mrf.mxu1 }
 0x44c   : > { %v2310_v13 = vpack.c.bf16 %v1935_v55, %v1932_v22  ;;  %v1927_v56 = vadd.f32 %v2257_v20, %v1926_v52  ;;  %1985 = sbr.rel (!%p3400_p6) target bundleno = 1132 (0x46c), region = 80 }
 0x44e   : > { %2314 = vst [vmem:[%s3305_s3 + $0x18] sm:$0xff] %v2310_v13   ;;  %v2305_v28 = vpack.c.bf16 %v1927_v56, %v1924_v53 }
 0x450   : > { %2313 = vst [vmem:[%s3305_s3 + $0x10] sm:$0xff] %v2305_v28  }
 0x451   : > { %s3411_s27 = smov (!%p1988_p4, %s1987_s27), 8 }
 0x452   : > { %s3315_s19 = sshll.u32 %s3411_s27, 6 }
 0x453   : > { %s1992_s20 = ssub.s32 512, %s3315_s19 }
 0x454   : > { %1993 = vsyncadd %s1979_s17, %s1992_s20  ;;  %p2277_p8 = scmp.ne.s32.totalorder %s3315_s19, 0  ;;  %s2291_s21 = sshll.u32 %s2988_s13, 9 }
 0x455   : > { %s3325_s29 = scalar_lea.hbm %s3382_s9, %s2291_s21  ;;  %s1998_s14 = sshll.u32 %s3305_s3, 4  ;;  %s3328_s14 = int_to_ptr.vmem [resolvable:$true] %s1998_s14 }
 0x456   : > { %s2828_s24 = scalar_lea.vmem %s3328_s14, %s3315_s19  ;;  %s2914_s1 = smov [#allocation11]  }
 0x457   : > { %p2829_p10 = scmp.ne.s32.totalorder %s3328_s14, %s2828_s24  ;;  %s2832_s16 = sshll.u32 %s2914_s1, 4  ;;  %s2833_s16 = int_to_ptr.vmem [resolvable:$false] %s2832_s16 }
 0x458   : > { %s2834_s13 = scalar_lea.vmem %s2833_s16, 1024  ;;  %p2835_p0 = scmp.lt.s32.totalorder %s3328_s14, %s2833_s16 }
 0x459   : > { %p2830_p1 = pnand %p2829_p10, %p2277_p8  ;;  %p2836_p2 = scmp.lt.s32.totalorder %s2834_s13, %s2828_s24 }
 0x45b   : > { %p2831_p3 = pneg %p2830_p1  ;;  %p2837_p9 = por %p2836_p2, %p2835_p0 }
 0x45d   : > { %p2838_p11 = pnand %p2837_p9, %p2831_p3 }
 0x45f   : > { %2841 = shalt.err (!%p2838_p11)
}
 0x460   : > { %s2842_s26 = scalar_lea.hbm %s3325_s29, %s3315_s19  ;;  %s2846_s27 = scalar_lea.hbm %s3382_s9, 832 }
 0x461   : > { %p2843_p7 = scmp.ne.s32.totalorder %s3325_s29, %s2842_s26  ;;  %p2847_p12 = scmp.lt.s32.totalorder %s3325_s29, %s3382_s9 }
 0x462   : > { %p2848_p6 = scmp.lt.s32.totalorder %s2846_s27, %s2842_s26 }
 0x463   : > { %p2844_p13 = pnand %p2843_p7, %p2277_p8 }
 0x464   : > { %p2849_p4 = por %p2848_p6, %p2847_p12 }
 0x465   : > { %p2845_p5 = pneg %p2844_p13 }
 0x467   : > { %p2850_p10 = pnand %p2849_p4, %p2845_p5 }
 0x469   : > { %2853 = shalt.err (!%p2850_p10)
}
 0x46a   : > { %s2915_s23 = smov 64   ;;  %s2916_s25 = smov 4  }
 0x46b   : > { %2004 = dma.vmem_to_hbm [thread:$0]  (%p2277_p8), %s3328_s14, %s3315_s19, %s3325_s29, %s1979_s17, %s2915_s23, %s2915_s23, %s2916_s25  }
 0x46c PF: > { %s2013_s24 = sand.u32 1, %s2888_s30   ;;  %p3401_p1 = scmp.ne.s32.totalorder %s3391_s22, 0 }
 0x46d   : > { %p3402_p3 = scmp.ge.s32.totalorder %s2900_s12, 2  ;;  %s2014_s1 = scalar_lea.sflag [#allocation4], %s2013_s24 }
 0x46f   : > { %p2462_p0 = pnand %p3402_p3, %p3401_p1 }
 0x471   : > { %p2463_p2 = pneg %p2462_p0 }
 0x473   : > { %2883 = dma.done.wait (%p2463_p2), %s2014_s1, 512  }
 0x474   : > { %2885 = vsyncadd (%p2463_p2), %s2014_s1, 4294966784  ;;  %s3403_s16 = sld [smem:[#allocation16_spill]]  ;;  %p24_p9 = scmp.ge.s32.totalorder %s2992_s15, 4  }
 0x475   : > { %s3404_s30 = smov %s2892_s10  ;;  %s3405_s10 = smov %s2896_s11 }
 0x476   : > { %s3407_s12 = smov %s2992_s15  ;;  %26 = sbr.rel (!%p24_p9) target bundleno = 10 (0xa), region = 117 }
 0x47a   : > { %s3406_s11 = smov %s3403_s16 }
 0x47b   :  { %2019 = vsyncpa [#allocation3], 1 }
 0x47c   :  { %2021 = vsyncpa [#allocation3 + $0x1], 1 }
 0x47d   :  { %2022 = vsyncpa [#allocation6], 1 }
 0x47e   :  { %2023 = vsyncpa [#allocation9], 1 }
 0x47f   :  { %2024 = vsyncpa [#allocation4], 1 }
 0x480   :  { %2026 = vsyncpa [#allocation4 + $0x1], 1 }

</bundles_post_ra>
